<compile_context>
chip_gen: v7x
topology: tpu7x:2x2x1
jax: 0.10.0
libtpu: 0.0.40
codegen_flags: <defaults>
</compile_context>

<pallas_src>
import math

import jax
import jax.numpy as jnp
from jax.experimental import pallas as pl
from jax.experimental.pallas import tpu as pltpu

# ------------------------------ configuration --------------------------------
BATCH   = 2          # batch size
SEQ     = 8          # tokens per sequence
DIM     = 32         # transformer dim
DEPTH   = 2          # number of (attention, mlp) layers
HEADS   = 4          # attention heads
MLP_DIM = 64         # hidden dim of MLP_Block
LN_EPS  = 1e-5
_GELU_C = math.sqrt(2.0 / math.pi)

# row indices inside the packed per-depth f32 vector table (DEPTH, 9, DIM)
_ALN_G, _ALN_B, _BQ, _BK, _BV, _BO, _MLN_G, _MLN_B, _B2 = range(9)


# ================================ Pallas kernel ===============================

def _transformer_kernel(x_ref, vec_ref, b1_ref, wattn_ref, w1_ref, w2_ref, o_ref):
    """Full Transformer forward on the whole (B*N, D) slab (single invocation)."""
    R, D = x_ref.shape                      # R = B*N rows
    N = SEQ
    B = R // N
    dh = D // HEADS
    scale = D ** (-0.5)                     # module uses dim**-0.5 (full dim)
    depth = wattn_ref.shape[0]

    def layernorm(x, g, b):
        mu = jnp.mean(x, axis=-1, keepdims=True)
        var = jnp.mean((x - mu) ** 2, axis=-1, keepdims=True)
        return (x - mu) * jax.lax.rsqrt(var + LN_EPS) * g + b

    def split_heads(t):
        # (R, D) -> (B*HEADS, N, dh); group index g = h*B + b (consistent q/k/v).
        hs = jnp.stack([t[:, h * dh:(h + 1) * dh] for h in range(HEADS)], axis=0)
        return hs.reshape(HEADS * B, N, dh)          # leading-dim reshape only

    x = x_ref[...].astype(jnp.float32)               # (R, D), f32

    for d in range(depth):                           # DEPTH=2 -> fully unrolled
        vec = vec_ref[d]                             # (9, D) f32 packed vectors
        b1 = b1_ref[d]                               # (1, MLP_DIM) f32

        # ---------- Residual(LayerNormalize(Attention)) ----------
        xn = layernorm(x, vec[_ALN_G:_ALN_G + 1], vec[_ALN_B:_ALN_B + 1]
                       ).astype(jnp.bfloat16)
        # three lane-aligned projections on the MXU, f32 accumulation
        q = jnp.dot(xn, wattn_ref[d, 0],
                    preferred_element_type=jnp.float32) + vec[_BQ:_BQ + 1]
        k = jnp.dot(xn, wattn_ref[d, 1],
                    preferred_element_type=jnp.float32) + vec[_BK:_BK + 1]
        v = jnp.dot(xn, wattn_ref[d, 2],
                    preferred_element_type=jnp.float32) + vec[_BV:_BV + 1]

        qh, kh, vh = split_heads(q), split_heads(k), split_heads(v)   # (G, N, dh)

        # one batched contraction for scores, one batched softmax, one for A@V
        dots = jnp.einsum('gnd,gmd->gnm', qh, kh,
                          preferred_element_type=jnp.float32) * scale  # (G, N, N)
        m = jnp.max(dots, axis=-1, keepdims=True)
        e = jnp.exp(dots - m)
        attn = e * pl.reciprocal(jnp.sum(e, axis=-1, keepdims=True), approx=True)
        ctx = jnp.einsum('gnm,gmd->gnd', attn, vh,
                         preferred_element_type=jnp.float32)           # (G, N, dh)

        # 'b h n d -> b n (h d)': leading reshape + lane concat, then ONE (R,D)@(D,D)
        ctx = ctx.reshape(HEADS, R, dh)
        out = jnp.concatenate([ctx[h] for h in range(HEADS)], axis=-1)  # (R, D)
        out = jnp.dot(out.astype(jnp.bfloat16), wattn_ref[d, 3],
                      preferred_element_type=jnp.float32) + vec[_BO:_BO + 1]
        # dropout: identity in eval mode
        x = x + out                                   # residual

        # ---------- Residual(LayerNormalize(MLP_Block)) ----------
        xn = layernorm(x, vec[_MLN_G:_MLN_G + 1], vec[_MLN_B:_MLN_B + 1]
                       ).astype(jnp.bfloat16)
        h1 = jnp.dot(xn, w1_ref[d],
                     preferred_element_type=jnp.float32) + b1          # (R, MLP)
        # module's tanh-approximation GELU
        h1 = 0.5 * h1 * (1.0 + jnp.tanh(_GELU_C * (h1 + 0.044715 * h1 * h1 * h1)))
        y = jnp.dot(h1.astype(jnp.bfloat16), w2_ref[d],
                    preferred_element_type=jnp.float32) + vec[_B2:_B2 + 1]
        # dropout: identity in eval mode
        x = x + y                                     # residual

    o_ref[...] = x.astype(o_ref.dtype)


# ================================ host wrapper ================================

@jax.jit
def transformer_forward(params, x):
    """x: (B, N, D) float32 -> (B, N, D) float32."""
    B, N, D = x.shape
    x2 = x.reshape(B * N, D).astype(jnp.float32)      # fold batch into rows
    args = (x2, params['vec'], params['b1'],
            params['w_attn'], params['w1'], params['w2'])

    out = pl.pallas_call(
        _transformer_kernel,
        out_shape=jax.ShapeDtypeStruct((B * N, D), jnp.float32),
        # no grid: single invocation, whole arrays resident in VMEM (a few KB)
        in_specs=[pl.BlockSpec(memory_space=pltpu.MemorySpace.VMEM)
                  for _ in args],
        out_specs=pl.BlockSpec(memory_space=pltpu.MemorySpace.VMEM),
    )(*args)
    return out.reshape(B, N, D)


# ============================== parameter init ================================

def _xavier(key, shape):
    fan_in, fan_out = shape[-2], shape[-1]
    limit = math.sqrt(6.0 / (fan_in + fan_out))
    return jax.random.uniform(key, shape, jnp.float32, -limit, limit)


def init_params(key):
    """Per-depth stacked parameters; MXU weights pre-cast to bf16 (once, here)."""
    ks = jax.random.split(key, 6)
    # fused qkv weight gets torch-style xavier on (D, 3D), then split lane-aligned
    wqkv = _xavier(ks[0], (DEPTH, DIM, 3 * DIM))
    wq, wk, wv = jnp.split(wqkv, 3, axis=-1)                     # (DEPTH, D, D) each
    wo = _xavier(ks[1], (DEPTH, DIM, DIM))
    w_attn = jnp.stack([wq, wk, wv, wo], axis=1).astype(jnp.bfloat16)  # (DEPTH,4,D,D)

    w1 = _xavier(ks[2], (DEPTH, DIM, MLP_DIM)).astype(jnp.bfloat16)
    w2 = _xavier(ks[3], (DEPTH, MLP_DIM, DIM)).astype(jnp.bfloat16)
    b1 = (1e-6 * jax.random.normal(ks[4], (DEPTH, 1, MLP_DIM))).astype(jnp.float32)
    b2 = (1e-6 * jax.random.normal(ks[5], (DEPTH, DIM))).astype(jnp.float32)

    ones = jnp.ones((DEPTH, DIM), jnp.float32)
    zeros = jnp.zeros((DEPTH, DIM), jnp.float32)
    # packed rows: [aln_g, aln_b, bq, bk, bv, bo, mln_g, mln_b, b2]
    vec = jnp.stack([ones, zeros, zeros, zeros, zeros, zeros, ones, zeros, b2],
                    axis=1)                                       # (DEPTH, 9, DIM)
    return dict(vec=vec, b1=b1, w_attn=w_attn, w1=w1, w2=w2)


# ==================================== main ====================================

if __name__ == "__main__":
    key = jax.random.PRNGKey(0)
    pkey, xkey = jax.random.split(key)
    params = init_params(pkey)
    x = jax.random.normal(xkey, (BATCH, SEQ, DIM), jnp.float32)

    out = jax.block_until_ready(transformer_forward(params, x))

    assert out.shape == (BATCH, SEQ, DIM)
    assert bool(jnp.all(jnp.isfinite(out)))
    print("KERNEL_OK")
</pallas_src>

<mosaic_0001>
module attributes {stable_mosaic.version = 11 : i64} {
  func.func @_transformer_kernel(%arg0: memref<16x32xf32, #tpu.memory_space<vmem>>, %arg1: memref<2x9x32xf32, #tpu.memory_space<vmem>>, %arg2: memref<2x1x64xf32, #tpu.memory_space<vmem>>, %arg3: memref<2x4x32x32xbf16, #tpu.memory_space<vmem>>, %arg4: memref<2x32x64xbf16, #tpu.memory_space<vmem>>, %arg5: memref<2x64x32xbf16, #tpu.memory_space<vmem>>, %arg6: memref<16x32xf32, #tpu.memory_space<vmem>>) attributes {dimension_semantics = [], scalar_prefetch = 0 : i64, scratch_operands = 0 : i64, tpu.core_type = #tpu.core_type<tc>} {
    %c0 = arith.constant 0 : index
    %c0_0 = arith.constant 0 : index
    %0 = vector.load %arg0[%c0, %c0_0] : memref<16x32xf32, #tpu.memory_space<vmem>>, vector<16x32xf32>
    %c0_1 = arith.constant 0 : index
    %c0_2 = arith.constant 0 : index
    %c0_3 = arith.constant 0 : index
    %1 = vector.load %arg1[%c0_1, %c0_2, %c0_3] : memref<2x9x32xf32, #tpu.memory_space<vmem>>, vector<1x9x32xf32>
    %2 = vector.shape_cast %1 : vector<1x9x32xf32> to vector<9x32xf32>
    %c0_4 = arith.constant 0 : index
    %c0_5 = arith.constant 0 : index
    %c0_6 = arith.constant 0 : index
    %3 = vector.load %arg2[%c0_4, %c0_5, %c0_6] : memref<2x1x64xf32, #tpu.memory_space<vmem>>, vector<1x1x64xf32>
    %4 = vector.shape_cast %3 : vector<1x1x64xf32> to vector<1x64xf32>
    %5 = vector.extract_strided_slice %2 {offsets = [0, 0], sizes = [1, 32], strides = [1, 1]} : vector<9x32xf32> to vector<1x32xf32>
    %6 = vector.extract_strided_slice %2 {offsets = [1, 0], sizes = [1, 32], strides = [1, 1]} : vector<9x32xf32> to vector<1x32xf32>
    %cst = arith.constant dense<0.000000e+00> : vector<16xf32>
    %7 = vector.multi_reduction <add>, %0, %cst [1] : vector<16x32xf32> to vector<16xf32>
    %8 = vector.shape_cast %7 : vector<16xf32> to vector<16x1xf32>
    %cst_7 = arith.constant 3.200000e+01 : f32
    %9 = vector.broadcast %cst_7 : f32 to vector<16x1xf32>
    %10 = arith.divf %8, %9 : vector<16x1xf32>
    %11 = vector.broadcast %10 : vector<16x1xf32> to vector<16x32xf32>
    %12 = arith.subf %0, %11 : vector<16x32xf32>
    %13 = arith.mulf %12, %12 : vector<16x32xf32>
    %cst_8 = arith.constant dense<0.000000e+00> : vector<16xf32>
    %14 = vector.multi_reduction <add>, %13, %cst_8 [1] : vector<16x32xf32> to vector<16xf32>
    %15 = vector.shape_cast %14 : vector<16xf32> to vector<16x1xf32>
    %cst_9 = arith.constant 3.200000e+01 : f32
    %16 = vector.broadcast %cst_9 : f32 to vector<16x1xf32>
    %17 = arith.divf %15, %16 : vector<16x1xf32>
    %18 = vector.broadcast %10 : vector<16x1xf32> to vector<16x32xf32>
    %19 = arith.subf %0, %18 : vector<16x32xf32>
    %cst_10 = arith.constant 9.99999974E-6 : f32
    %20 = vector.broadcast %cst_10 : f32 to vector<16x1xf32>
    %21 = arith.addf %17, %20 : vector<16x1xf32>
    %22 = math.rsqrt %21 : vector<16x1xf32>
    %23 = vector.broadcast %22 : vector<16x1xf32> to vector<16x32xf32>
    %24 = arith.mulf %19, %23 : vector<16x32xf32>
    %25 = vector.broadcast %5 : vector<1x32xf32> to vector<16x32xf32>
    %26 = arith.mulf %24, %25 : vector<16x32xf32>
    %27 = vector.broadcast %6 : vector<1x32xf32> to vector<16x32xf32>
    %28 = arith.addf %26, %27 : vector<16x32xf32>
    %29 = arith.truncf %28 : vector<16x32xf32> to vector<16x32xbf16>
    %c0_11 = arith.constant 0 : index
    %c0_12 = arith.constant 0 : index
    %c0_13 = arith.constant 0 : index
    %c0_14 = arith.constant 0 : index
    %30 = vector.load %arg3[%c0_11, %c0_12, %c0_13, %c0_14] : memref<2x4x32x32xbf16, #tpu.memory_space<vmem>>, vector<1x1x32x32xbf16>
    %31 = vector.shape_cast %30 : vector<1x1x32x32xbf16> to vector<32x32xbf16>
    %cst_15 = arith.constant dense<0.000000e+00> : vector<16x32xf32>
    %32 = tpu.matmul %29, %31, %cst_15 {dimension_numbers = #tpu.dot_dimension_numbers<[1], [0], [0], [1], [0, 0, 1, 1], [], []>} : vector<16x32xbf16>, vector<32x32xbf16>, vector<16x32xf32> -> vector<16x32xf32>
    %33 = vector.extract_strided_slice %2 {offsets = [2, 0], sizes = [1, 32], strides = [1, 1]} : vector<9x32xf32> to vector<1x32xf32>
    %34 = vector.broadcast %33 : vector<1x32xf32> to vector<16x32xf32>
    %35 = arith.addf %32, %34 : vector<16x32xf32>
    %c0_16 = arith.constant 0 : index
    %c1 = arith.constant 1 : index
    %c0_17 = arith.constant 0 : index
    %c0_18 = arith.constant 0 : index
    %36 = vector.load %arg3[%c0_16, %c1, %c0_17, %c0_18] : memref<2x4x32x32xbf16, #tpu.memory_space<vmem>>, vector<1x1x32x32xbf16>
    %37 = vector.shape_cast %36 : vector<1x1x32x32xbf16> to vector<32x32xbf16>
    %cst_19 = arith.constant dense<0.000000e+00> : vector<16x32xf32>
    %38 = tpu.matmul %29, %37, %cst_19 {dimension_numbers = #tpu.dot_dimension_numbers<[1], [0], [0], [1], [0, 0, 1, 1], [], []>} : vector<16x32xbf16>, vector<32x32xbf16>, vector<16x32xf32> -> vector<16x32xf32>
    %39 = vector.extract_strided_slice %2 {offsets = [3, 0], sizes = [1, 32], strides = [1, 1]} : vector<9x32xf32> to vector<1x32xf32>
    %40 = vector.broadcast %39 : vector<1x32xf32> to vector<16x32xf32>
    %41 = arith.addf %38, %40 : vector<16x32xf32>
    %c0_20 = arith.constant 0 : index
    %c2 = arith.constant 2 : index
    %c0_21 = arith.constant 0 : index
    %c0_22 = arith.constant 0 : index
    %42 = vector.load %arg3[%c0_20, %c2, %c0_21, %c0_22] : memref<2x4x32x32xbf16, #tpu.memory_space<vmem>>, vector<1x1x32x32xbf16>
    %43 = vector.shape_cast %42 : vector<1x1x32x32xbf16> to vector<32x32xbf16>
    %cst_23 = arith.constant dense<0.000000e+00> : vector<16x32xf32>
    %44 = tpu.matmul %29, %43, %cst_23 {dimension_numbers = #tpu.dot_dimension_numbers<[1], [0], [0], [1], [0, 0, 1, 1], [], []>} : vector<16x32xbf16>, vector<32x32xbf16>, vector<16x32xf32> -> vector<16x32xf32>
    %45 = vector.extract_strided_slice %2 {offsets = [4, 0], sizes = [1, 32], strides = [1, 1]} : vector<9x32xf32> to vector<1x32xf32>
    %46 = vector.broadcast %45 : vector<1x32xf32> to vector<16x32xf32>
    %47 = arith.addf %44, %46 : vector<16x32xf32>
    %48 = vector.extract_strided_slice %35 {offsets = [0, 0], sizes = [16, 8], strides = [1, 1]} : vector<16x32xf32> to vector<16x8xf32>
    %49 = vector.extract_strided_slice %35 {offsets = [0, 8], sizes = [16, 8], strides = [1, 1]} : vector<16x32xf32> to vector<16x8xf32>
    %50 = vector.extract_strided_slice %35 {offsets = [0, 16], sizes = [16, 8], strides = [1, 1]} : vector<16x32xf32> to vector<16x8xf32>
    %51 = vector.extract_strided_slice %35 {offsets = [0, 24], sizes = [16, 8], strides = [1, 1]} : vector<16x32xf32> to vector<16x8xf32>
    %52 = vector.shape_cast %48 : vector<16x8xf32> to vector<1x16x8xf32>
    %53 = vector.shape_cast %49 : vector<16x8xf32> to vector<1x16x8xf32>
    %54 = vector.shape_cast %50 : vector<16x8xf32> to vector<1x16x8xf32>
    %55 = vector.shape_cast %51 : vector<16x8xf32> to vector<1x16x8xf32>
    %56 = tpu.concatenate %52, %53, %54, %55 in 0 : vector<1x16x8xf32>, vector<1x16x8xf32>, vector<1x16x8xf32>, vector<1x16x8xf32> -> vector<4x16x8xf32>
    %57 = vector.shape_cast %56 : vector<4x16x8xf32> to vector<8x8x8xf32>
    %58 = vector.extract_strided_slice %41 {offsets = [0, 0], sizes = [16, 8], strides = [1, 1]} : vector<16x32xf32> to vector<16x8xf32>
    %59 = vector.extract_strided_slice %41 {offsets = [0, 8], sizes = [16, 8], strides = [1, 1]} : vector<16x32xf32> to vector<16x8xf32>
    %60 = vector.extract_strided_slice %41 {offsets = [0, 16], sizes = [16, 8], strides = [1, 1]} : vector<16x32xf32> to vector<16x8xf32>
    %61 = vector.extract_strided_slice %41 {offsets = [0, 24], sizes = [16, 8], strides = [1, 1]} : vector<16x32xf32> to vector<16x8xf32>
    %62 = vector.shape_cast %58 : vector<16x8xf32> to vector<1x16x8xf32>
    %63 = vector.shape_cast %59 : vector<16x8xf32> to vector<1x16x8xf32>
    %64 = vector.shape_cast %60 : vector<16x8xf32> to vector<1x16x8xf32>
    %65 = vector.shape_cast %61 : vector<16x8xf32> to vector<1x16x8xf32>
    %66 = tpu.concatenate %62, %63, %64, %65 in 0 : vector<1x16x8xf32>, vector<1x16x8xf32>, vector<1x16x8xf32>, vector<1x16x8xf32> -> vector<4x16x8xf32>
    %67 = vector.shape_cast %66 : vector<4x16x8xf32> to vector<8x8x8xf32>
    %68 = vector.extract_strided_slice %47 {offsets = [0, 0], sizes = [16, 8], strides = [1, 1]} : vector<16x32xf32> to vector<16x8xf32>
    %69 = vector.extract_strided_slice %47 {offsets = [0, 8], sizes = [16, 8], strides = [1, 1]} : vector<16x32xf32> to vector<16x8xf32>
    %70 = vector.extract_strided_slice %47 {offsets = [0, 16], sizes = [16, 8], strides = [1, 1]} : vector<16x32xf32> to vector<16x8xf32>
    %71 = vector.extract_strided_slice %47 {offsets = [0, 24], sizes = [16, 8], strides = [1, 1]} : vector<16x32xf32> to vector<16x8xf32>
    %72 = vector.shape_cast %68 : vector<16x8xf32> to vector<1x16x8xf32>
    %73 = vector.shape_cast %69 : vector<16x8xf32> to vector<1x16x8xf32>
    %74 = vector.shape_cast %70 : vector<16x8xf32> to vector<1x16x8xf32>
    %75 = vector.shape_cast %71 : vector<16x8xf32> to vector<1x16x8xf32>
    %76 = tpu.concatenate %72, %73, %74, %75 in 0 : vector<1x16x8xf32>, vector<1x16x8xf32>, vector<1x16x8xf32>, vector<1x16x8xf32> -> vector<4x16x8xf32>
    %77 = vector.shape_cast %76 : vector<4x16x8xf32> to vector<8x8x8xf32>
    "tpu.trace_start"() <{level = 10 : i32, message = "gnd,gmd->gnm"}> : () -> ()
    %cst_24 = arith.constant dense<0.000000e+00> : vector<8x8x8xf32>
    %78 = tpu.matmul %57, %67, %cst_24 {dimension_numbers = #tpu.dot_dimension_numbers<[2], [2], [1], [1], [0, 0, 0, 1, 1, 1], [0], [0]>} : vector<8x8x8xf32>, vector<8x8x8xf32>, vector<8x8x8xf32> -> vector<8x8x8xf32>
    "tpu.trace_stop"() : () -> ()
    %cst_25 = arith.constant 0.176776692 : f32
    %79 = vector.broadcast %cst_25 : f32 to vector<8x8x8xf32>
    %80 = arith.mulf %78, %79 : vector<8x8x8xf32>
    %cst_26 = arith.constant dense<0xFF800000> : vector<8x8xf32>
    %81 = vector.multi_reduction <maximumf>, %80, %cst_26 [2] : vector<8x8x8xf32> to vector<8x8xf32>
    %82 = vector.shape_cast %81 : vector<8x8xf32> to vector<8x8x1xf32>
    %83 = vector.broadcast %82 : vector<8x8x1xf32> to vector<8x8x8xf32>
    %84 = arith.subf %80, %83 : vector<8x8x8xf32>
    %85 = math.exp %84 : vector<8x8x8xf32>
    %cst_27 = arith.constant dense<0.000000e+00> : vector<8x8xf32>
    %86 = vector.multi_reduction <add>, %85, %cst_27 [2] : vector<8x8x8xf32> to vector<8x8xf32>
    %87 = vector.shape_cast %86 : vector<8x8xf32> to vector<8x8x1xf32>
    %88 = tpu.reciprocal %87 {approx = true} : vector<8x8x1xf32> -> vector<8x8x1xf32>
    %89 = vector.broadcast %88 : vector<8x8x1xf32> to vector<8x8x8xf32>
    %90 = arith.mulf %85, %89 : vector<8x8x8xf32>
    "tpu.trace_start"() <{level = 10 : i32, message = "gnm,gmd->gnd"}> : () -> ()
    %cst_28 = arith.constant dense<0.000000e+00> : vector<8x8x8xf32>
    %91 = tpu.matmul %90, %77, %cst_28 {dimension_numbers = #tpu.dot_dimension_numbers<[2], [1], [1], [2], [0, 0, 0, 1, 1, 2], [0], [0]>} : vector<8x8x8xf32>, vector<8x8x8xf32>, vector<8x8x8xf32> -> vector<8x8x8xf32>
    "tpu.trace_stop"() : () -> ()
    %92 = vector.shape_cast %91 : vector<8x8x8xf32> to vector<4x16x8xf32>
    %93 = vector.extract_strided_slice %92 {offsets = [0, 0, 0], sizes = [1, 16, 8], strides = [1, 1, 1]} : vector<4x16x8xf32> to vector<1x16x8xf32>
    %94 = vector.shape_cast %93 : vector<1x16x8xf32> to vector<16x8xf32>
    %95 = vector.extract_strided_slice %92 {offsets = [1, 0, 0], sizes = [1, 16, 8], strides = [1, 1, 1]} : vector<4x16x8xf32> to vector<1x16x8xf32>
    %96 = vector.shape_cast %95 : vector<1x16x8xf32> to vector<16x8xf32>
    %97 = vector.extract_strided_slice %92 {offsets = [2, 0, 0], sizes = [1, 16, 8], strides = [1, 1, 1]} : vector<4x16x8xf32> to vector<1x16x8xf32>
    %98 = vector.shape_cast %97 : vector<1x16x8xf32> to vector<16x8xf32>
    %99 = vector.extract_strided_slice %92 {offsets = [3, 0, 0], sizes = [1, 16, 8], strides = [1, 1, 1]} : vector<4x16x8xf32> to vector<1x16x8xf32>
    %100 = vector.shape_cast %99 : vector<1x16x8xf32> to vector<16x8xf32>
    %101 = tpu.concatenate %94, %96, %98, %100 in 1 : vector<16x8xf32>, vector<16x8xf32>, vector<16x8xf32>, vector<16x8xf32> -> vector<16x32xf32>
    %102 = arith.truncf %101 : vector<16x32xf32> to vector<16x32xbf16>
    %c0_29 = arith.constant 0 : index
    %c3 = arith.constant 3 : index
    %c0_30 = arith.constant 0 : index
    %c0_31 = arith.constant 0 : index
    %103 = vector.load %arg3[%c0_29, %c3, %c0_30, %c0_31] : memref<2x4x32x32xbf16, #tpu.memory_space<vmem>>, vector<1x1x32x32xbf16>
    %104 = vector.shape_cast %103 : vector<1x1x32x32xbf16> to vector<32x32xbf16>
    %cst_32 = arith.constant dense<0.000000e+00> : vector<16x32xf32>
    %105 = tpu.matmul %102, %104, %cst_32 {dimension_numbers = #tpu.dot_dimension_numbers<[1], [0], [0], [1], [0, 0, 1, 1], [], []>} : vector<16x32xbf16>, vector<32x32xbf16>, vector<16x32xf32> -> vector<16x32xf32>
    %106 = vector.extract_strided_slice %2 {offsets = [5, 0], sizes = [1, 32], strides = [1, 1]} : vector<9x32xf32> to vector<1x32xf32>
    %107 = vector.broadcast %106 : vector<1x32xf32> to vector<16x32xf32>
    %108 = arith.addf %105, %107 : vector<16x32xf32>
    %109 = arith.addf %0, %108 : vector<16x32xf32>
    %110 = vector.extract_strided_slice %2 {offsets = [6, 0], sizes = [1, 32], strides = [1, 1]} : vector<9x32xf32> to vector<1x32xf32>
    %111 = vector.extract_strided_slice %2 {offsets = [7, 0], sizes = [1, 32], strides = [1, 1]} : vector<9x32xf32> to vector<1x32xf32>
    %cst_33 = arith.constant dense<0.000000e+00> : vector<16xf32>
    %112 = vector.multi_reduction <add>, %109, %cst_33 [1] : vector<16x32xf32> to vector<16xf32>
    %113 = vector.shape_cast %112 : vector<16xf32> to vector<16x1xf32>
    %cst_34 = arith.constant 3.200000e+01 : f32
    %114 = vector.broadcast %cst_34 : f32 to vector<16x1xf32>
    %115 = arith.divf %113, %114 : vector<16x1xf32>
    %116 = vector.broadcast %115 : vector<16x1xf32> to vector<16x32xf32>
    %117 = arith.subf %109, %116 : vector<16x32xf32>
    %118 = arith.mulf %117, %117 : vector<16x32xf32>
    %cst_35 = arith.constant dense<0.000000e+00> : vector<16xf32>
    %119 = vector.multi_reduction <add>, %118, %cst_35 [1] : vector<16x32xf32> to vector<16xf32>
    %120 = vector.shape_cast %119 : vector<16xf32> to vector<16x1xf32>
    %cst_36 = arith.constant 3.200000e+01 : f32
    %121 = vector.broadcast %cst_36 : f32 to vector<16x1xf32>
    %122 = arith.divf %120, %121 : vector<16x1xf32>
    %123 = vector.broadcast %115 : vector<16x1xf32> to vector<16x32xf32>
    %124 = arith.subf %109, %123 : vector<16x32xf32>
    %cst_37 = arith.constant 9.99999974E-6 : f32
    %125 = vector.broadcast %cst_37 : f32 to vector<16x1xf32>
    %126 = arith.addf %122, %125 : vector<16x1xf32>
    %127 = math.rsqrt %126 : vector<16x1xf32>
    %128 = vector.broadcast %127 : vector<16x1xf32> to vector<16x32xf32>
    %129 = arith.mulf %124, %128 : vector<16x32xf32>
    %130 = vector.broadcast %110 : vector<1x32xf32> to vector<16x32xf32>
    %131 = arith.mulf %129, %130 : vector<16x32xf32>
    %132 = vector.broadcast %111 : vector<1x32xf32> to vector<16x32xf32>
    %133 = arith.addf %131, %132 : vector<16x32xf32>
    %134 = arith.truncf %133 : vector<16x32xf32> to vector<16x32xbf16>
    %c0_38 = arith.constant 0 : index
    %c0_39 = arith.constant 0 : index
    %c0_40 = arith.constant 0 : index
    %135 = vector.load %arg4[%c0_38, %c0_39, %c0_40] : memref<2x32x64xbf16, #tpu.memory_space<vmem>>, vector<1x32x64xbf16>
    %136 = vector.shape_cast %135 : vector<1x32x64xbf16> to vector<32x64xbf16>
    %cst_41 = arith.constant dense<0.000000e+00> : vector<16x64xf32>
    %137 = tpu.matmul %134, %136, %cst_41 {dimension_numbers = #tpu.dot_dimension_numbers<[1], [0], [0], [1], [0, 0, 1, 1], [], []>} : vector<16x32xbf16>, vector<32x64xbf16>, vector<16x64xf32> -> vector<16x64xf32>
    %138 = vector.broadcast %4 : vector<1x64xf32> to vector<16x64xf32>
    %139 = arith.addf %137, %138 : vector<16x64xf32>
    %cst_42 = arith.constant 5.000000e-01 : f32
    %140 = vector.broadcast %cst_42 : f32 to vector<16x64xf32>
    %141 = arith.mulf %140, %139 : vector<16x64xf32>
    %cst_43 = arith.constant 4.471500e-02 : f32
    %142 = vector.broadcast %cst_43 : f32 to vector<16x64xf32>
    %143 = arith.mulf %142, %139 : vector<16x64xf32>
    %144 = arith.mulf %143, %139 : vector<16x64xf32>
    %145 = arith.mulf %144, %139 : vector<16x64xf32>
    %146 = arith.addf %139, %145 : vector<16x64xf32>
    %cst_44 = arith.constant 0.797884583 : f32
    %147 = vector.broadcast %cst_44 : f32 to vector<16x64xf32>
    %148 = arith.mulf %147, %146 : vector<16x64xf32>
    %149 = math.tanh %148 : vector<16x64xf32>
    %cst_45 = arith.constant 1.000000e+00 : f32
    %150 = vector.broadcast %cst_45 : f32 to vector<16x64xf32>
    %151 = arith.addf %150, %149 : vector<16x64xf32>
    %152 = arith.mulf %141, %151 : vector<16x64xf32>
    %153 = arith.truncf %152 : vector<16x64xf32> to vector<16x64xbf16>
    %c0_46 = arith.constant 0 : index
    %c0_47 = arith.constant 0 : index
    %c0_48 = arith.constant 0 : index
    %154 = vector.load %arg5[%c0_46, %c0_47, %c0_48] : memref<2x64x32xbf16, #tpu.memory_space<vmem>>, vector<1x64x32xbf16>
    %155 = vector.shape_cast %154 : vector<1x64x32xbf16> to vector<64x32xbf16>
    %cst_49 = arith.constant dense<0.000000e+00> : vector<16x32xf32>
    %156 = tpu.matmul %153, %155, %cst_49 {dimension_numbers = #tpu.dot_dimension_numbers<[1], [0], [0], [1], [0, 0, 1, 1], [], []>} : vector<16x64xbf16>, vector<64x32xbf16>, vector<16x32xf32> -> vector<16x32xf32>
    %157 = vector.extract_strided_slice %2 {offsets = [8, 0], sizes = [1, 32], strides = [1, 1]} : vector<9x32xf32> to vector<1x32xf32>
    %158 = vector.broadcast %157 : vector<1x32xf32> to vector<16x32xf32>
    %159 = arith.addf %156, %158 : vector<16x32xf32>
    %160 = arith.addf %109, %159 : vector<16x32xf32>
    %c1_50 = arith.constant 1 : index
    %c0_51 = arith.constant 0 : index
    %c0_52 = arith.constant 0 : index
    %161 = vector.load %arg1[%c1_50, %c0_51, %c0_52] : memref<2x9x32xf32, #tpu.memory_space<vmem>>, vector<1x9x32xf32>
    %162 = vector.shape_cast %161 : vector<1x9x32xf32> to vector<9x32xf32>
    %c1_53 = arith.constant 1 : index
    %c0_54 = arith.constant 0 : index
    %c0_55 = arith.constant 0 : index
    %163 = vector.load %arg2[%c1_53, %c0_54, %c0_55] : memref<2x1x64xf32, #tpu.memory_space<vmem>>, vector<1x1x64xf32>
    %164 = vector.shape_cast %163 : vector<1x1x64xf32> to vector<1x64xf32>
    %165 = vector.extract_strided_slice %162 {offsets = [0, 0], sizes = [1, 32], strides = [1, 1]} : vector<9x32xf32> to vector<1x32xf32>
    %166 = vector.extract_strided_slice %162 {offsets = [1, 0], sizes = [1, 32], strides = [1, 1]} : vector<9x32xf32> to vector<1x32xf32>
    %cst_56 = arith.constant dense<0.000000e+00> : vector<16xf32>
    %167 = vector.multi_reduction <add>, %160, %cst_56 [1] : vector<16x32xf32> to vector<16xf32>
    %168 = vector.shape_cast %167 : vector<16xf32> to vector<16x1xf32>
    %cst_57 = arith.constant 3.200000e+01 : f32
    %169 = vector.broadcast %cst_57 : f32 to vector<16x1xf32>
    %170 = arith.divf %168, %169 : vector<16x1xf32>
    %171 = vector.broadcast %170 : vector<16x1xf32> to vector<16x32xf32>
    %172 = arith.subf %160, %171 : vector<16x32xf32>
    %173 = arith.mulf %172, %172 : vector<16x32xf32>
    %cst_58 = arith.constant dense<0.000000e+00> : vector<16xf32>
    %174 = vector.multi_reduction <add>, %173, %cst_58 [1] : vector<16x32xf32> to vector<16xf32>
    %175 = vector.shape_cast %174 : vector<16xf32> to vector<16x1xf32>
    %cst_59 = arith.constant 3.200000e+01 : f32
    %176 = vector.broadcast %cst_59 : f32 to vector<16x1xf32>
    %177 = arith.divf %175, %176 : vector<16x1xf32>
    %178 = vector.broadcast %170 : vector<16x1xf32> to vector<16x32xf32>
    %179 = arith.subf %160, %178 : vector<16x32xf32>
    %cst_60 = arith.constant 9.99999974E-6 : f32
    %180 = vector.broadcast %cst_60 : f32 to vector<16x1xf32>
    %181 = arith.addf %177, %180 : vector<16x1xf32>
    %182 = math.rsqrt %181 : vector<16x1xf32>
    %183 = vector.broadcast %182 : vector<16x1xf32> to vector<16x32xf32>
    %184 = arith.mulf %179, %183 : vector<16x32xf32>
    %185 = vector.broadcast %165 : vector<1x32xf32> to vector<16x32xf32>
    %186 = arith.mulf %184, %185 : vector<16x32xf32>
    %187 = vector.broadcast %166 : vector<1x32xf32> to vector<16x32xf32>
    %188 = arith.addf %186, %187 : vector<16x32xf32>
    %189 = arith.truncf %188 : vector<16x32xf32> to vector<16x32xbf16>
    %c1_61 = arith.constant 1 : index
    %c0_62 = arith.constant 0 : index
    %c0_63 = arith.constant 0 : index
    %c0_64 = arith.constant 0 : index
    %190 = vector.load %arg3[%c1_61, %c0_62, %c0_63, %c0_64] : memref<2x4x32x32xbf16, #tpu.memory_space<vmem>>, vector<1x1x32x32xbf16>
    %191 = vector.shape_cast %190 : vector<1x1x32x32xbf16> to vector<32x32xbf16>
    %cst_65 = arith.constant dense<0.000000e+00> : vector<16x32xf32>
    %192 = tpu.matmul %189, %191, %cst_65 {dimension_numbers = #tpu.dot_dimension_numbers<[1], [0], [0], [1], [0, 0, 1, 1], [], []>} : vector<16x32xbf16>, vector<32x32xbf16>, vector<16x32xf32> -> vector<16x32xf32>
    %193 = vector.extract_strided_slice %162 {offsets = [2, 0], sizes = [1, 32], strides = [1, 1]} : vector<9x32xf32> to vector<1x32xf32>
    %194 = vector.broadcast %193 : vector<1x32xf32> to vector<16x32xf32>
    %195 = arith.addf %192, %194 : vector<16x32xf32>
    %c1_66 = arith.constant 1 : index
    %c1_67 = arith.constant 1 : index
    %c0_68 = arith.constant 0 : index
    %c0_69 = arith.constant 0 : index
    %196 = vector.load %arg3[%c1_66, %c1_67, %c0_68, %c0_69] : memref<2x4x32x32xbf16, #tpu.memory_space<vmem>>, vector<1x1x32x32xbf16>
    %197 = vector.shape_cast %196 : vector<1x1x32x32xbf16> to vector<32x32xbf16>
    %cst_70 = arith.constant dense<0.000000e+00> : vector<16x32xf32>
    %198 = tpu.matmul %189, %197, %cst_70 {dimension_numbers = #tpu.dot_dimension_numbers<[1], [0], [0], [1], [0, 0, 1, 1], [], []>} : vector<16x32xbf16>, vector<32x32xbf16>, vector<16x32xf32> -> vector<16x32xf32>
    %199 = vector.extract_strided_slice %162 {offsets = [3, 0], sizes = [1, 32], strides = [1, 1]} : vector<9x32xf32> to vector<1x32xf32>
    %200 = vector.broadcast %199 : vector<1x32xf32> to vector<16x32xf32>
    %201 = arith.addf %198, %200 : vector<16x32xf32>
    %c1_71 = arith.constant 1 : index
    %c2_72 = arith.constant 2 : index
    %c0_73 = arith.constant 0 : index
    %c0_74 = arith.constant 0 : index
    %202 = vector.load %arg3[%c1_71, %c2_72, %c0_73, %c0_74] : memref<2x4x32x32xbf16, #tpu.memory_space<vmem>>, vector<1x1x32x32xbf16>
    %203 = vector.shape_cast %202 : vector<1x1x32x32xbf16> to vector<32x32xbf16>
    %cst_75 = arith.constant dense<0.000000e+00> : vector<16x32xf32>
    %204 = tpu.matmul %189, %203, %cst_75 {dimension_numbers = #tpu.dot_dimension_numbers<[1], [0], [0], [1], [0, 0, 1, 1], [], []>} : vector<16x32xbf16>, vector<32x32xbf16>, vector<16x32xf32> -> vector<16x32xf32>
    %205 = vector.extract_strided_slice %162 {offsets = [4, 0], sizes = [1, 32], strides = [1, 1]} : vector<9x32xf32> to vector<1x32xf32>
    %206 = vector.broadcast %205 : vector<1x32xf32> to vector<16x32xf32>
    %207 = arith.addf %204, %206 : vector<16x32xf32>
    %208 = vector.extract_strided_slice %195 {offsets = [0, 0], sizes = [16, 8], strides = [1, 1]} : vector<16x32xf32> to vector<16x8xf32>
    %209 = vector.extract_strided_slice %195 {offsets = [0, 8], sizes = [16, 8], strides = [1, 1]} : vector<16x32xf32> to vector<16x8xf32>
    %210 = vector.extract_strided_slice %195 {offsets = [0, 16], sizes = [16, 8], strides = [1, 1]} : vector<16x32xf32> to vector<16x8xf32>
    %211 = vector.extract_strided_slice %195 {offsets = [0, 24], sizes = [16, 8], strides = [1, 1]} : vector<16x32xf32> to vector<16x8xf32>
    %212 = vector.shape_cast %208 : vector<16x8xf32> to vector<1x16x8xf32>
    %213 = vector.shape_cast %209 : vector<16x8xf32> to vector<1x16x8xf32>
    %214 = vector.shape_cast %210 : vector<16x8xf32> to vector<1x16x8xf32>
    %215 = vector.shape_cast %211 : vector<16x8xf32> to vector<1x16x8xf32>
    %216 = tpu.concatenate %212, %213, %214, %215 in 0 : vector<1x16x8xf32>, vector<1x16x8xf32>, vector<1x16x8xf32>, vector<1x16x8xf32> -> vector<4x16x8xf32>
    %217 = vector.shape_cast %216 : vector<4x16x8xf32> to vector<8x8x8xf32>
    %218 = vector.extract_strided_slice %201 {offsets = [0, 0], sizes = [16, 8], strides = [1, 1]} : vector<16x32xf32> to vector<16x8xf32>
    %219 = vector.extract_strided_slice %201 {offsets = [0, 8], sizes = [16, 8], strides = [1, 1]} : vector<16x32xf32> to vector<16x8xf32>
    %220 = vector.extract_strided_slice %201 {offsets = [0, 16], sizes = [16, 8], strides = [1, 1]} : vector<16x32xf32> to vector<16x8xf32>
    %221 = vector.extract_strided_slice %201 {offsets = [0, 24], sizes = [16, 8], strides = [1, 1]} : vector<16x32xf32> to vector<16x8xf32>
    %222 = vector.shape_cast %218 : vector<16x8xf32> to vector<1x16x8xf32>
    %223 = vector.shape_cast %219 : vector<16x8xf32> to vector<1x16x8xf32>
    %224 = vector.shape_cast %220 : vector<16x8xf32> to vector<1x16x8xf32>
    %225 = vector.shape_cast %221 : vector<16x8xf32> to vector<1x16x8xf32>
    %226 = tpu.concatenate %222, %223, %224, %225 in 0 : vector<1x16x8xf32>, vector<1x16x8xf32>, vector<1x16x8xf32>, vector<1x16x8xf32> -> vector<4x16x8xf32>
    %227 = vector.shape_cast %226 : vector<4x16x8xf32> to vector<8x8x8xf32>
    %228 = vector.extract_strided_slice %207 {offsets = [0, 0], sizes = [16, 8], strides = [1, 1]} : vector<16x32xf32> to vector<16x8xf32>
    %229 = vector.extract_strided_slice %207 {offsets = [0, 8], sizes = [16, 8], strides = [1, 1]} : vector<16x32xf32> to vector<16x8xf32>
    %230 = vector.extract_strided_slice %207 {offsets = [0, 16], sizes = [16, 8], strides = [1, 1]} : vector<16x32xf32> to vector<16x8xf32>
    %231 = vector.extract_strided_slice %207 {offsets = [0, 24], sizes = [16, 8], strides = [1, 1]} : vector<16x32xf32> to vector<16x8xf32>
    %232 = vector.shape_cast %228 : vector<16x8xf32> to vector<1x16x8xf32>
    %233 = vector.shape_cast %229 : vector<16x8xf32> to vector<1x16x8xf32>
    %234 = vector.shape_cast %230 : vector<16x8xf32> to vector<1x16x8xf32>
    %235 = vector.shape_cast %231 : vector<16x8xf32> to vector<1x16x8xf32>
    %236 = tpu.concatenate %232, %233, %234, %235 in 0 : vector<1x16x8xf32>, vector<1x16x8xf32>, vector<1x16x8xf32>, vector<1x16x8xf32> -> vector<4x16x8xf32>
    %237 = vector.shape_cast %236 : vector<4x16x8xf32> to vector<8x8x8xf32>
    "tpu.trace_start"() <{level = 10 : i32, message = "gnd,gmd->gnm"}> : () -> ()
    %cst_76 = arith.constant dense<0.000000e+00> : vector<8x8x8xf32>
    %238 = tpu.matmul %217, %227, %cst_76 {dimension_numbers = #tpu.dot_dimension_numbers<[2], [2], [1], [1], [0, 0, 0, 1, 1, 1], [0], [0]>} : vector<8x8x8xf32>, vector<8x8x8xf32>, vector<8x8x8xf32> -> vector<8x8x8xf32>
    "tpu.trace_stop"() : () -> ()
    %cst_77 = arith.constant 0.176776692 : f32
    %239 = vector.broadcast %cst_77 : f32 to vector<8x8x8xf32>
    %240 = arith.mulf %238, %239 : vector<8x8x8xf32>
    %cst_78 = arith.constant dense<0xFF800000> : vector<8x8xf32>
    %241 = vector.multi_reduction <maximumf>, %240, %cst_78 [2] : vector<8x8x8xf32> to vector<8x8xf32>
    %242 = vector.shape_cast %241 : vector<8x8xf32> to vector<8x8x1xf32>
    %243 = vector.broadcast %242 : vector<8x8x1xf32> to vector<8x8x8xf32>
    %244 = arith.subf %240, %243 : vector<8x8x8xf32>
    %245 = math.exp %244 : vector<8x8x8xf32>
    %cst_79 = arith.constant dense<0.000000e+00> : vector<8x8xf32>
    %246 = vector.multi_reduction <add>, %245, %cst_79 [2] : vector<8x8x8xf32> to vector<8x8xf32>
    %247 = vector.shape_cast %246 : vector<8x8xf32> to vector<8x8x1xf32>
    %248 = tpu.reciprocal %247 {approx = true} : vector<8x8x1xf32> -> vector<8x8x1xf32>
    %249 = vector.broadcast %248 : vector<8x8x1xf32> to vector<8x8x8xf32>
    %250 = arith.mulf %245, %249 : vector<8x8x8xf32>
    "tpu.trace_start"() <{level = 10 : i32, message = "gnm,gmd->gnd"}> : () -> ()
    %cst_80 = arith.constant dense<0.000000e+00> : vector<8x8x8xf32>
    %251 = tpu.matmul %250, %237, %cst_80 {dimension_numbers = #tpu.dot_dimension_numbers<[2], [1], [1], [2], [0, 0, 0, 1, 1, 2], [0], [0]>} : vector<8x8x8xf32>, vector<8x8x8xf32>, vector<8x8x8xf32> -> vector<8x8x8xf32>
    "tpu.trace_stop"() : () -> ()
    %252 = vector.shape_cast %251 : vector<8x8x8xf32> to vector<4x16x8xf32>
    %253 = vector.extract_strided_slice %252 {offsets = [0, 0, 0], sizes = [1, 16, 8], strides = [1, 1, 1]} : vector<4x16x8xf32> to vector<1x16x8xf32>
    %254 = vector.shape_cast %253 : vector<1x16x8xf32> to vector<16x8xf32>
    %255 = vector.extract_strided_slice %252 {offsets = [1, 0, 0], sizes = [1, 16, 8], strides = [1, 1, 1]} : vector<4x16x8xf32> to vector<1x16x8xf32>
    %256 = vector.shape_cast %255 : vector<1x16x8xf32> to vector<16x8xf32>
    %257 = vector.extract_strided_slice %252 {offsets = [2, 0, 0], sizes = [1, 16, 8], strides = [1, 1, 1]} : vector<4x16x8xf32> to vector<1x16x8xf32>
    %258 = vector.shape_cast %257 : vector<1x16x8xf32> to vector<16x8xf32>
    %259 = vector.extract_strided_slice %252 {offsets = [3, 0, 0], sizes = [1, 16, 8], strides = [1, 1, 1]} : vector<4x16x8xf32> to vector<1x16x8xf32>
    %260 = vector.shape_cast %259 : vector<1x16x8xf32> to vector<16x8xf32>
    %261 = tpu.concatenate %254, %256, %258, %260 in 1 : vector<16x8xf32>, vector<16x8xf32>, vector<16x8xf32>, vector<16x8xf32> -> vector<16x32xf32>
    %262 = arith.truncf %261 : vector<16x32xf32> to vector<16x32xbf16>
    %c1_81 = arith.constant 1 : index
    %c3_82 = arith.constant 3 : index
    %c0_83 = arith.constant 0 : index
    %c0_84 = arith.constant 0 : index
    %263 = vector.load %arg3[%c1_81, %c3_82, %c0_83, %c0_84] : memref<2x4x32x32xbf16, #tpu.memory_space<vmem>>, vector<1x1x32x32xbf16>
    %264 = vector.shape_cast %263 : vector<1x1x32x32xbf16> to vector<32x32xbf16>
    %cst_85 = arith.constant dense<0.000000e+00> : vector<16x32xf32>
    %265 = tpu.matmul %262, %264, %cst_85 {dimension_numbers = #tpu.dot_dimension_numbers<[1], [0], [0], [1], [0, 0, 1, 1], [], []>} : vector<16x32xbf16>, vector<32x32xbf16>, vector<16x32xf32> -> vector<16x32xf32>
    %266 = vector.extract_strided_slice %162 {offsets = [5, 0], sizes = [1, 32], strides = [1, 1]} : vector<9x32xf32> to vector<1x32xf32>
    %267 = vector.broadcast %266 : vector<1x32xf32> to vector<16x32xf32>
    %268 = arith.addf %265, %267 : vector<16x32xf32>
    %269 = arith.addf %160, %268 : vector<16x32xf32>
    %270 = vector.extract_strided_slice %162 {offsets = [6, 0], sizes = [1, 32], strides = [1, 1]} : vector<9x32xf32> to vector<1x32xf32>
    %271 = vector.extract_strided_slice %162 {offsets = [7, 0], sizes = [1, 32], strides = [1, 1]} : vector<9x32xf32> to vector<1x32xf32>
    %cst_86 = arith.constant dense<0.000000e+00> : vector<16xf32>
    %272 = vector.multi_reduction <add>, %269, %cst_86 [1] : vector<16x32xf32> to vector<16xf32>
    %273 = vector.shape_cast %272 : vector<16xf32> to vector<16x1xf32>
    %cst_87 = arith.constant 3.200000e+01 : f32
    %274 = vector.broadcast %cst_87 : f32 to vector<16x1xf32>
    %275 = arith.divf %273, %274 : vector<16x1xf32>
    %276 = vector.broadcast %275 : vector<16x1xf32> to vector<16x32xf32>
    %277 = arith.subf %269, %276 : vector<16x32xf32>
    %278 = arith.mulf %277, %277 : vector<16x32xf32>
    %cst_88 = arith.constant dense<0.000000e+00> : vector<16xf32>
    %279 = vector.multi_reduction <add>, %278, %cst_88 [1] : vector<16x32xf32> to vector<16xf32>
    %280 = vector.shape_cast %279 : vector<16xf32> to vector<16x1xf32>
    %cst_89 = arith.constant 3.200000e+01 : f32
    %281 = vector.broadcast %cst_89 : f32 to vector<16x1xf32>
    %282 = arith.divf %280, %281 : vector<16x1xf32>
    %283 = vector.broadcast %275 : vector<16x1xf32> to vector<16x32xf32>
    %284 = arith.subf %269, %283 : vector<16x32xf32>
    %cst_90 = arith.constant 9.99999974E-6 : f32
    %285 = vector.broadcast %cst_90 : f32 to vector<16x1xf32>
    %286 = arith.addf %282, %285 : vector<16x1xf32>
    %287 = math.rsqrt %286 : vector<16x1xf32>
    %288 = vector.broadcast %287 : vector<16x1xf32> to vector<16x32xf32>
    %289 = arith.mulf %284, %288 : vector<16x32xf32>
    %290 = vector.broadcast %270 : vector<1x32xf32> to vector<16x32xf32>
    %291 = arith.mulf %289, %290 : vector<16x32xf32>
    %292 = vector.broadcast %271 : vector<1x32xf32> to vector<16x32xf32>
    %293 = arith.addf %291, %292 : vector<16x32xf32>
    %294 = arith.truncf %293 : vector<16x32xf32> to vector<16x32xbf16>
    %c1_91 = arith.constant 1 : index
    %c0_92 = arith.constant 0 : index
    %c0_93 = arith.constant 0 : index
    %295 = vector.load %arg4[%c1_91, %c0_92, %c0_93] : memref<2x32x64xbf16, #tpu.memory_space<vmem>>, vector<1x32x64xbf16>
    %296 = vector.shape_cast %295 : vector<1x32x64xbf16> to vector<32x64xbf16>
    %cst_94 = arith.constant dense<0.000000e+00> : vector<16x64xf32>
    %297 = tpu.matmul %294, %296, %cst_94 {dimension_numbers = #tpu.dot_dimension_numbers<[1], [0], [0], [1], [0, 0, 1, 1], [], []>} : vector<16x32xbf16>, vector<32x64xbf16>, vector<16x64xf32> -> vector<16x64xf32>
    %298 = vector.broadcast %164 : vector<1x64xf32> to vector<16x64xf32>
    %299 = arith.addf %297, %298 : vector<16x64xf32>
    %cst_95 = arith.constant 5.000000e-01 : f32
    %300 = vector.broadcast %cst_95 : f32 to vector<16x64xf32>
    %301 = arith.mulf %300, %299 : vector<16x64xf32>
    %cst_96 = arith.constant 4.471500e-02 : f32
    %302 = vector.broadcast %cst_96 : f32 to vector<16x64xf32>
    %303 = arith.mulf %302, %299 : vector<16x64xf32>
    %304 = arith.mulf %303, %299 : vector<16x64xf32>
    %305 = arith.mulf %304, %299 : vector<16x64xf32>
    %306 = arith.addf %299, %305 : vector<16x64xf32>
    %cst_97 = arith.constant 0.797884583 : f32
    %307 = vector.broadcast %cst_97 : f32 to vector<16x64xf32>
    %308 = arith.mulf %307, %306 : vector<16x64xf32>
    %309 = math.tanh %308 : vector<16x64xf32>
    %cst_98 = arith.constant 1.000000e+00 : f32
    %310 = vector.broadcast %cst_98 : f32 to vector<16x64xf32>
    %311 = arith.addf %310, %309 : vector<16x64xf32>
    %312 = arith.mulf %301, %311 : vector<16x64xf32>
    %313 = arith.truncf %312 : vector<16x64xf32> to vector<16x64xbf16>
    %c1_99 = arith.constant 1 : index
    %c0_100 = arith.constant 0 : index
    %c0_101 = arith.constant 0 : index
    %314 = vector.load %arg5[%c1_99, %c0_100, %c0_101] : memref<2x64x32xbf16, #tpu.memory_space<vmem>>, vector<1x64x32xbf16>
    %315 = vector.shape_cast %314 : vector<1x64x32xbf16> to vector<64x32xbf16>
    %cst_102 = arith.constant dense<0.000000e+00> : vector<16x32xf32>
    %316 = tpu.matmul %313, %315, %cst_102 {dimension_numbers = #tpu.dot_dimension_numbers<[1], [0], [0], [1], [0, 0, 1, 1], [], []>} : vector<16x64xbf16>, vector<64x32xbf16>, vector<16x32xf32> -> vector<16x32xf32>
    %317 = vector.extract_strided_slice %162 {offsets = [8, 0], sizes = [1, 32], strides = [1, 1]} : vector<9x32xf32> to vector<1x32xf32>
    %318 = vector.broadcast %317 : vector<1x32xf32> to vector<16x32xf32>
    %319 = arith.addf %316, %318 : vector<16x32xf32>
    %320 = arith.addf %269, %319 : vector<16x32xf32>
    %c0_103 = arith.constant 0 : index
    %c0_104 = arith.constant 0 : index
    %321 = vector.load %arg6[%c0_103, %c0_104] : memref<16x32xf32, #tpu.memory_space<vmem>>, vector<16x32xf32>
    tpu.vector_store %arg6[%c0_103, %c0_104], %320 {strides = array<i32>} : memref<16x32xf32, #tpu.memory_space<vmem>>, vector<16x32xf32>,
    return
  }
}

</mosaic_0001>

<bundles_post_ra>
// kernel: transformer_forward.1
= control target key start
LH: loop header
LB: loop body
LE: loop exit
PB: predicated region body
PF: predicated region fallthrough
CT: control target
= control target key end

     0   :  { %11 = vsyncpa [#allocation3], 0  ;;  %s5128_s0 = inlined_call_operand.hbm [shape: f32[16,32], index: 0, kind: input, shape index: {}]   ;;  %s5129_s1 = inlined_call_operand.vmem [shape: f32[2,9,32], index: 1, kind: input, shape index: {}]   ;;  %s5130_s2 = inlined_call_operand.vmem [shape: f32[2,1,64], index: 2, kind: input, shape index: {}]   ;;  %s5131_s3 = inlined_call_operand.vmem [shape: bf16[2,4,32,32], index: 3, kind: input, shape index: {}]   ;;  %s5132_s4 = inlined_call_operand.vmem [shape: bf16[2,32,64], index: 4, kind: input, shape index: {}]   ;;  %s5133_s5 = inlined_call_operand.vmem [shape: bf16[2,64,32], index: 5, kind: input, shape index: {}]   ;;  %s5134_s6 = inlined_call_operand.hbm [shape: f32[16,32], index: 6, kind: output, shape index: {}]  }
   0x1   :  { %12 = vsyncpa [#allocation4], 0  ;;  %s4487_s21 = smov [#allocation2]   ;;  %s4439_s25 = scalar_lea.hbm %s5128_s0, 256 }
   0x2   :  { %s18_s22 = sshll.u32 %s4487_s21, 4  ;;  %p4440_p0 = scmp.ne.s32.totalorder %s5128_s0, %s4439_s25  ;;  %s19_s22 = int_to_ptr.vmem [resolvable:$true] %s18_s22 }
   0x3   :  { %p4443_p1 = scmp.lt.u32.totalorder %s4439_s25, %s5128_s0 }
   0x5   :  { %p4445_p2 = pnand %p4443_p1, %p4440_p0 }
   0x7   :  { %4448 = shalt.err (!%p4445_p2)
}
   0x8   :  { %s4449_s30 = scalar_lea.vmem %s19_s22, 256  ;;  %p4454_p4 = scmp.lt.s32.totalorder %s19_s22, %s19_s22 }
   0x9   :  { %p4450_p3 = scmp.ne.s32.totalorder %s19_s22, %s4449_s30  ;;  %p4455_p5 = scmp.lt.s32.totalorder %s4449_s30, %s4449_s30 }
   0xb   :  { %p4456_p6 = por %p4455_p5, %p4454_p4 }
   0xd   :  { %p4457_p7 = pnand %p4456_p6, %p4450_p3 }
   0xf   :  { %4460 = shalt.err (!%p4457_p7)
}
  0x10   :  { %s4488_s7 = smov 128   ;;  %s4489_s8 = smov 8  }
  0x11   :  { %24 = dma.hbm_to_vmem [thread:$0]  %s5128_s0, 256, %s19_s22, [#allocation3], %s4488_s7, %s4488_s7, %s4489_s8  }
  0x12   :  { %4483 = dma.done.wait [#allocation3], 256  }
  0x13   :  { %4484 = vsyncadd [#allocation3], 4294967040  ;;  %vm44_vm0 = vcmask 261120   ;;  %v4548_v0 = vld [vmem:[#allocation2] sm:$0xff]  ;;  %v4550_v1 = vld [vmem:[#allocation2 + $0x8] sm:$0xff]  ;;  %v4490_v16 = vmov 0.0   ;;  %v72_v23 = vlaneseq }
  0x14   :  { %v45_v2 = vsel %vm44_vm0, %v4548_v0, 0.0  ;;  %v48_v3 = vsel %vm44_vm0, %v4550_v1, 0.0  ;;  %v4323_v14 = vld [vmem:[%s5131_s3] sm:$0xff]   ;;  %4018 = vmatprep.subr.bf16.mxu1 %v4490_v16  ;;  %4034 = vmatprep.subr.bf16.mxu0 %v4490_v16  ;;  %v4325_v17 = vld [vmem:[%s5131_s3 + $0x8] sm:$0xff]   ;;  %vm4491_vm1 = vmmov 0   ;;  %v4327_v40 = vld [vmem:[%s5131_s3 + $0x10] sm:$0xff]  }
  0x15   :  { %46 = vadd.xlane.f32.xlu0 %v45_v2  ;;  %v4324_v15 = vld [vmem:[%s5131_s3 + $0x20] sm:$0xff]   ;;  %4019 = vmatpush3.bf16.msra.mxu1 %v4323_v14  ;;  %v4326_v18 = vld [vmem:[%s5131_s3 + $0x28] sm:$0xff]   ;;  %v4582_v26 = vshrl.u32 %v72_v23, 7  ;;  %v4328_v42 = vld [vmem:[%s5131_s3 + $0x18] sm:$0xff]   ;;  %s4492_s24 = smov 112   ;;  %s4493_s25 = smov 120  }
  0x16   :  { %4035 = vmatpush3.bf16.msra.mxu0 %v4324_v15  ;;  %4020 = vmatprep.subr.bf16.mxu1 %v4490_v16  ;;  %v4588_v28 = vld [vmem:[%s5129_s1] sm:$0xff]  ;;  %vm321_vm2 = vcmask 64512   ;;  %s4494_s26 = smov 104   ;;  %s4495_s9 = smov 16   ;;  %vm1620_vm3 = vcmask 130048   ;;  %vm1623_vm4 = vcmask 195584  }
  0x17   :  { %4036 = vmatprep.subr.bf16.mxu0 %v4490_v16  ;;  %4022 = vmatprep.mubr.msk.bf16.mxu1 %vm4491_vm1, %v4490_v16  ;;  %v74_v27 = vsub.s32 0, %v4582_v26  ;;  %v80_v32 = vsub.s32 1, %v4582_v26  ;;  %v91_v43 = vsub.s32 2, %v4582_v26  ;;  %v156_v50 = vsub.s32 3, %v4582_v26  ;;  %s4496_s10 = smov 24   ;;  %s4497_s15 = smov [#allocation5]  }
  0x18   :  { %4038 = vmatprep.mubr.msk.bf16.mxu0 %vm4491_vm1, %v4490_v16  ;;  %vm1854_vm5 = vcmask 523264   ;;  %s3767_s16 = sshll.u32 %s4497_s15, 4  ;;  %s3768_s16 = int_to_ptr.vmem [resolvable:$true] %s3767_s16 }
  0x19   :  { %49 = vadd.xlane.f32.xlu0 %v48_v3  ;;  %4021 = vmatpush3.bf16.msra.mxu1 %v4325_v17  ;;  %v75_v31 = vrot.slane %v4588_v28, %v74_v27  ;;  %v81_v36 = vrot.slane %v4588_v28, %v80_v32  ;;  %v92_v44 = vrot.slane %v4588_v28, %v91_v43  ;;  %s4461_s17 = scalar_lea.vmem %s3768_s16, 256  ;;  %p4466_p9 = scmp.lt.s32.totalorder %s3768_s16, %s3768_s16 }
  0x1a   :  { %4037 = vmatpush3.bf16.msra.mxu0 %v4326_v18  ;;  %4026 = vmatprep.subr.bf16.mxu1 %v4490_v16  ;;  %v157_v56 = vrot.slane %v4588_v28, %v156_v50  ;;  %p4462_p8 = scmp.ne.s32.totalorder %s3768_s16, %s4461_s17  ;;  %p4467_p10 = scmp.lt.s32.totalorder %s4461_s17, %s4461_s17 }
  0x1b   :  { %4052 = vmatprep.subr.mxu0 %v4490_v16 }
  0x1c   :  { %p4468_p11 = por %p4467_p10, %p4466_p9 }
  0x1e   :  { %p4469_p12 = pnand %p4468_p11, %p4462_p8 }
  0xa2   :  { %v47_v4 = vpop.xlane.xlu0 %46 }
  0xa3   :  { %v52_v5 = vmul.f32 0.03125, %v47_v4 }
  0xa5   :  { %v54_v6 = vsub.f32 %v4548_v0, %v52_v5 }
  0xa6   :  { %v50_v7 = vpop.xlane.xlu0 %49 }
  0xa7   :  { %v53_v8 = vmul.f32 0.03125, %v50_v7  ;;  %v56_v9 = vmul.f32 %v54_v6, %v54_v6 }
  0xa9   :  { %v55_v10 = vsub.f32 %v4550_v1, %v53_v8  ;;  %v58_v11 = vsel %vm44_vm0, %v56_v9, 0.0 }
  0xaa   :  { %59 = vadd.xlane.f32.xlu1 %v58_v11 }
  0xab   :  { %v57_v12 = vmul.f32 %v55_v10, %v55_v10 }
  0xad   :  { %v61_v13 = vsel %vm44_vm0, %v57_v12, 0.0 }
  0xae   :  { %62 = vadd.xlane.f32.xlu1 %v61_v13 }
 0x137   :  { %v60_v19 = vpop.xlane.xlu1 %59 }
 0x138   :  { %v64_v20 = vmul.f32 0.03125, %v60_v19 }
 0x13a   :  { %v66_v21 = vadd.f32 1e-05, %v64_v20 }
 0x13b   :  { %v63_v22 = vpop.xlane.xlu1 %62 }
 0x13c   :  { %4351 = vrsqrt.f32 %v66_v21  ;;  %v65_v24 = vmul.f32 0.03125, %v63_v22 }
 0x13e   :  { %v67_v25 = vadd.f32 1e-05, %v65_v24 }
 0x140   :  { %4353 = vrsqrt.f32 %v67_v25 }
 0x146   :  { %v4352_v29 = vpop.eup %4351 }
 0x147   :  { %v70_v30 = vmul.f32 %v4352_v29, %v54_v6  ;;  %v218_v6 = vsub.s32 4, %v4582_v26 }
 0x149   :  { %v76_v35 = vmul.f32 %v75_v31, %v70_v30  ;;  %v219_v9 = vrot.slane %v4588_v28, %v218_v6 }
 0x14a   :  { %v4354_v33 = vpop.eup %4353 }
 0x14b   :  { %v71_v34 = vmul.f32 %v4354_v33, %v55_v10  ;;  %v82_v38 = vadd.f32 %v81_v36, %v76_v35 }
 0x14d   :  { %v77_v37 = vmul.f32 %v75_v31, %v71_v34 }
 0x14f   :  { %v83_v39 = vadd.f32 %v81_v36, %v77_v37 }
 0x151   :  { %v84_v41 = vpack.c.bf16 %v83_v39, %v82_v38 }
 0x153   :  { %4023 = vmatmul.mubr.msk.bf16.vlgmr.msra.gmra.mrb[0].mxu1 %vm44_vm0, %v84_v41  ;;  %4039 = vmatmul.mubr.msk.bf16.vlgmr.msra.gmra.mrb[0].mxu0 %vm44_vm0, %v84_v41 }
 0x154   :  { %4027 = vmatpush3.bf16.msra.mxu1 %v4327_v40  ;;  %4030 = vmatprep.mubr.msk.bf16.mxu1 %vm4491_vm1, %v4490_v16 }
 0x155   :  { %4028 = vmatprep.subr.bf16.mxu1 %v4490_v16  ;;  %4054 = vmatprep.mubr.msk.f32.mxu0 %vm4491_vm1, %v4490_v16 }
 0x158   :  { %4029 = vmatpush3.bf16.msra.mxu1 %v4328_v42 }
 0x159   :  { %4042 = vmatprep.subr.mxu1 %v4490_v16 }
 0x15b   :  { %4031 = vmatmul.mubr.msk.bf16.vlgmr.msra.gmra.mrb[4].mxu1 %vm44_vm0, %v84_v41 }
 0x15c   :  { %4044 = vmatprep.mubr.msk.f32.mxu1 %vm4491_vm1, %v4490_v16 }
 0x226   :  { %v142_v45 = vpop.f32.mrb[0].mxu1  ;;  %v4618_v46 = vpop.f32.mrb[0].mxu0 }
 0x227   :  { %v143_v47 = vadd.f32 %v142_v45, %v92_v44  ;;  %v4024_v48 = vpop.f32.mrb[1].mxu1  ;;  %v4040_v49 = vpop.f32.mrb[1].mxu0  ;;  %v4671_v12 = vadd.f32 %v4618_v46, %v219_v9 }
 0x228   :  { %v145_v51 = vpop.f32.mrb[2].mxu1  ;;  %v4621_v52 = vpop.f32.mrb[2].mxu0 }
 0x229   :  { %v4041_v53 = vpop.f32.mrb[3].mxu0  ;;  %279 = vrot.lane.b32.xlu0 %v143_v47, %s4492_s24  ;;  %275 = vrot.lane.b32.xlu1 %v143_v47, %s4493_s25  ;;  %v4025_v54 = vpop.f32.mrb[3].mxu1  ;;  %v146_v55 = vadd.f32 %v145_v51, %v92_v44  ;;  %v4685_v15 = vadd.f32 %v4621_v52, %v219_v9 }
 0x22d   :  { %277 = vrot.lane.b32.xlu1 %v146_v55, %s4493_s25 }
 0x22e   :  { %v204_v57 = vpop.f32.mrb[4].mxu1 }
 0x22f   :  { %v205_v58 = vadd.f32 %v204_v57, %v157_v56  ;;  %v4032_v59 = vpop.f32.mrb[5].mxu1 }
 0x230   :  { %v207_v60 = vpop.f32.mrb[6].mxu1 }
 0x231   :  { %281 = vrot.lane.b32.xlu1 %v146_v55, %s4492_s24  ;;  %289 = vrot.lane.b32.xlu0 %v205_v58, %s4493_s25  ;;  %v4033_v61 = vpop.f32.mrb[7].mxu1  ;;  %v208_v62 = vadd.f32 %v207_v60, %v157_v56 }
 0x232   :  { %4043 = vmatpush3.xpose.msk.msra.mxu1 %vm321_vm2, %v205_v58 }
 0x233   :  { %4047 = vmatprep.subr.mxu1 %v4490_v16 }
 0x235   :  { %4045 = vmatmul.mubr.msk.f32.vlgmr.msra.gmra.mrb[8].mxu1 %vm321_vm2, %v143_v47  ;;  %293 = vrot.lane.b32.xlu0 %v205_v58, %s4492_s24 }
 0x236   :  { %291 = vrot.lane.b32.xlu1 %v208_v62, %s4493_s25  ;;  %4048 = vmatpush3.xpose.msk.msra.mxu1 %vm321_vm2, %v208_v62 }
 0x237   :  { %4049 = vmatprep.mubr.msk.f32.mxu1 %vm4491_vm1, %v4490_v16  ;;  %4057 = vmatprep.subr.mxu1 %v4490_v16 }
 0x239   :  { %4050 = vmatmul.mubr.msk.f32.vlgmr.msra.gmra.mrb[10].mxu1 %vm321_vm2, %v146_v55  ;;  %297 = vrot.lane.b32.xlu0 %v205_v58, %s4494_s26 }
 0x23a   :  { %295 = vrot.lane.b32.xlu1 %v208_v62, %s4492_s24  ;;  %4059 = vmatprep.mubr.msk.f32.mxu1 %vm4491_vm1, %v4490_v16 }
 0x23d   :  { %283 = vrot.lane.b32.xlu0 %v143_v47, %s4494_s26 }
 0x23e   :  { %299 = vrot.lane.b32.xlu1 %v208_v62, %s4494_s26 }
 0x242   :  { %285 = vrot.lane.b32.xlu1 %v146_v55, %s4494_s26 }
 0x29b   :  { %v276_v63 = vpop.permute.xlu1 %275  ;;  %v280_v2 = vpop.permute.xlu0 %279 }
 0x29f   :  { %v278_v3 = vpop.permute.xlu1 %277 }
 0x2a3   :  { %v282_v4 = vpop.permute.xlu1 %281  ;;  %v290_v5 = vpop.permute.xlu0 %289 }
 0x2a4   :  { %4053 = vmatpush3.xpose.msk.msra.mxu0 %vm321_vm2, %v290_v5 }
 0x2a5   :  { %4062 = vmatprep.subr.mxu0 %v4490_v16 }
 0x2a7   :  { %4055 = vmatmul.mubr.msk.f32.vlgmr.msra.gmra.mrb[4].mxu0 %vm321_vm2, %v276_v63  ;;  %v294_v7 = vpop.permute.xlu0 %293 }
 0x2a8   :  { %v292_v8 = vpop.permute.xlu1 %291  ;;  %4063 = vmatpush3.xpose.msk.msra.mxu0 %vm321_vm2, %v294_v7  ;;  %4064 = vmatprep.mubr.msk.f32.mxu0 %vm4491_vm1, %v4490_v16 }
 0x2a9   :  { %4058 = vmatpush3.xpose.msk.msra.mxu1 %vm321_vm2, %v292_v8  ;;  %4072 = vmatprep.subr.mxu0 %v4490_v16 }
 0x2aa   :  { %4067 = vmatprep.subr.mxu1 %v4490_v16 }
 0x2ab   :  { %4065 = vmatmul.mubr.msk.f32.vlgmr.msra.gmra.mrb[6].mxu0 %vm321_vm2, %v280_v2  ;;  %v298_v10 = vpop.permute.xlu0 %297 }
 0x2ac   :  { %v296_v11 = vpop.permute.xlu1 %295  ;;  %4060 = vmatmul.mubr.msk.f32.vlgmr.msra.gmra.mrb[12].mxu1 %vm321_vm2, %v278_v3  ;;  %4073 = vmatpush3.xpose.msk.msra.mxu0 %vm321_vm2, %v298_v10 }
 0x2ad   :  { %4068 = vmatpush3.xpose.msk.msra.mxu1 %vm321_vm2, %v296_v11  ;;  %4069 = vmatprep.mubr.msk.f32.mxu1 %vm4491_vm1, %v4490_v16 }
 0x2ae   :  { %4074 = vmatprep.mubr.msk.f32.mxu0 %vm4491_vm1, %v4490_v16  ;;  %4082 = vmatprep.subr.mxu0 %v4490_v16 }
 0x2af   :  { %v284_v13 = vpop.permute.xlu0 %283  ;;  %4077 = vmatprep.subr.mxu1 %v4490_v16 }
 0x2b0   :  { %v300_v14 = vpop.permute.xlu1 %299  ;;  %4070 = vmatmul.mubr.msk.f32.vlgmr.msra.gmra.mrb[14].mxu1 %vm321_vm2, %v282_v4  ;;  %4075 = vmatmul.mubr.msk.f32.vlgmr.msra.gmra.mrb[8].mxu0 %vm321_vm2, %v284_v13 }
 0x2b1   :  { %4078 = vmatpush3.xpose.msk.msra.mxu1 %vm321_vm2, %v300_v14  ;;  %4083 = vmatpush3.msra.mxu0 %v4671_v12 }
 0x2b2   :  { %4079 = vmatprep.mubr.msk.f32.mxu1 %vm4491_vm1, %v4490_v16  ;;  %4087 = vmatprep.subr.mxu1 %v4490_v16 }
 0x2b3   :  { %4084 = vmatprep.mubr.msk.f32.mxu0 %vm4491_vm1, %v4490_v16  ;;  %4092 = vmatprep.subr.mxu0 %v4490_v16 }
 0x2b4   :  { %v286_v17 = vpop.permute.xlu1 %285 }
 0x2b5   :  { %4080 = vmatmul.mubr.msk.f32.vlgmr.msra.gmra.mrb[16].mxu1 %vm321_vm2, %v286_v17 }
 0x2b6   :  { %4088 = vmatpush3.msra.mxu1 %v4685_v15  ;;  %4089 = vmatprep.mubr.msk.f32.mxu1 %vm4491_vm1, %v4490_v16 }
 0x2b7   :  { %4097 = vmatprep.subr.mxu1 %v4490_v16 }
 0x308   :  { %v392_v18 = vpop.f32.mrb[8].mxu1 }
 0x309   :  { %v914_v19 = vmul.f32 0.17677669, %v392_v18  ;;  %v4046_v20 = vpop.f32.mrb[9].mxu1 }
 0x30b   :  { %v922_v21 = vsel %vm321_vm2, %v914_v19, -inf }
 0x30c   :  { %923 = vmax.xlane.f32.xlu0 %v922_v21  ;;  %v466_v22 = vpop.f32.mrb[10].mxu1 }
 0x30d   :  { %v915_v23 = vmul.f32 0.17677669, %v466_v22  ;;  %v4051_v24 = vpop.f32.mrb[11].mxu1 }
 0x30f   :  { %v925_v25 = vsel %vm321_vm2, %v915_v23, -inf }
 0x310   :  { %926 = vmax.xlane.f32.xlu1 %v925_v25 }
 0x37a   :  { %v540_v29 = vpop.f32.mrb[4].mxu0 }
 0x37b   :  { %v916_v30 = vmul.f32 0.17677669, %v540_v29  ;;  %v4056_v31 = vpop.f32.mrb[5].mxu0 }
 0x37d   :  { %v928_v33 = vsel %vm321_vm2, %v916_v30, -inf }
 0x37e   :  { %v688_v34 = vpop.f32.mrb[6].mxu0  ;;  %929 = vmax.xlane.f32.xlu0 %v928_v33 }
 0x37f   :  { %v614_v35 = vpop.f32.mrb[12].mxu1  ;;  %v4066_v36 = vpop.f32.mrb[7].mxu0  ;;  %v918_v39 = vmul.f32 0.17677669, %v688_v34 }
 0x380   :  { %v917_v37 = vmul.f32 0.17677669, %v614_v35  ;;  %v4061_v38 = vpop.f32.mrb[13].mxu1 }
 0x381   :  { %v934_v48 = vsel %vm321_vm2, %v918_v39, -inf }
 0x382   :  { %v931_v40 = vsel %vm321_vm2, %v917_v37, -inf }
 0x383   :  { %932 = vmax.xlane.f32.xlu0 %v931_v40  ;;  %v762_v41 = vpop.f32.mrb[14].mxu1  ;;  %v836_v42 = vpop.f32.mrb[8].mxu0 }
 0x384   :  { %v919_v44 = vmul.f32 0.17677669, %v762_v41  ;;  %v4071_v45 = vpop.f32.mrb[15].mxu1  ;;  %v4076_v46 = vpop.f32.mrb[9].mxu0  ;;  %v920_v47 = vmul.f32 0.17677669, %v836_v42 }
 0x386   :  { %v937_v49 = vsel %vm321_vm2, %v919_v44, -inf  ;;  %v940_v54 = vsel %vm321_vm2, %v920_v47, -inf }
 0x387   :  { %935 = vmax.xlane.f32.xlu0 %v934_v48  ;;  %938 = vmax.xlane.f32.xlu1 %v937_v49 }
 0x388   :  { %v910_v51 = vpop.f32.mrb[16].mxu1 }
 0x389   :  { %v921_v52 = vmul.f32 0.17677669, %v910_v51  ;;  %v4081_v53 = vpop.f32.mrb[17].mxu1 }
 0x38b   :  { %941 = vmax.xlane.f32.xlu0 %v940_v54  ;;  %v943_v55 = vsel %vm321_vm2, %v921_v52, -inf }
 0x38c   :  { %944 = vmax.xlane.f32.xlu1 %v943_v55 }
 0x399   :  { %v924_v56 = vpop.xlane.xlu0 %923 }
 0x39a   :  { %v946_v57 = vsub.f32 %v914_v19, %v924_v56 }
 0x39c   :  { %v954_v58 = vmul.f32 1.442695, %v946_v57 }
 0x39d   :  { %305 = vrot.lane.b32.xlu1 %v4685_v15, %s4493_s25  ;;  %v927_v59 = vpop.xlane.xlu1 %926 }
 0x39e   :  { %4355 = vpow2.f32 %v954_v58  ;;  %v947_v60 = vsub.f32 %v915_v23, %v927_v59 }
 0x3a0   :  { %v956_v61 = vmul.f32 1.442695, %v947_v60 }
 0x3a1   :  { %303 = vrot.lane.b32.xlu0 %v4671_v12, %s4493_s25  ;;  %309 = vrot.lane.b32.xlu1 %v4671_v12, %s4492_s24 }
 0x3a2   :  { %4357 = vpow2.f32 %v956_v61 }
 0x3a5   :  { %311 = vrot.lane.b32.xlu1 %v4685_v15, %s4492_s24 }
 0x3a8   :  { %v4356_v62 = vpop.eup %4355 }
 0x3a9   :  { %v970_v63 = vsel %vm321_vm2, %v4356_v62, 0.0 }
 0x3ac   :  { %v4358_v2 = vpop.eup %4357 }
 0x3ad   :  { %v973_v3 = vsel %vm321_vm2, %v4358_v2, 0.0 }
 0x3c0   :  { %971 = vadd.xlane.f32.xlu0 %v970_v63 }
 0x3c9   :  { %974 = vadd.xlane.f32.xlu1 %v973_v3 }
 0x40b   :  { %v930_v4 = vpop.xlane.xlu0 %929 }
 0x40c   :  { %v948_v5 = vsub.f32 %v916_v30, %v930_v4 }
 0x40e   :  { %v958_v7 = vmul.f32 1.442695, %v948_v5 }
 0x410   :  { %4359 = vpow2.f32 %v958_v7  ;;  %v933_v8 = vpop.xlane.xlu0 %932 }
 0x411   :  { %v949_v9 = vsub.f32 %v917_v37, %v933_v8 }
 0x413   :  { %v960_v10 = vmul.f32 1.442695, %v949_v9 }
 0x414   :  { %v936_v11 = vpop.xlane.xlu0 %935  ;;  %v939_v13 = vpop.xlane.xlu1 %938 }
 0x415   :  { %4361 = vpow2.f32 %v960_v10  ;;  %v950_v14 = vsub.f32 %v918_v39, %v936_v11  ;;  %v951_v17 = vsub.f32 %v919_v44, %v939_v13 }
 0x417   :  { %v962_v18 = vmul.f32 1.442695, %v950_v14  ;;  %v964_v19 = vmul.f32 1.442695, %v951_v17 }
 0x418   :  { %v942_v20 = vpop.xlane.xlu0 %941 }
 0x419   :  { %4363 = vpow2.f32 %v962_v18  ;;  %v952_v21 = vsub.f32 %v920_v47, %v942_v20  ;;  %v945_v22 = vpop.xlane.xlu1 %944  ;;  %v4329_v20 = vld [vmem:[%s5131_s3 + $0x30] sm:$0xff]  }
 0x41a   :  { %v4360_v23 = vpop.eup %4359  ;;  %4365 = vpow2.f32 %v964_v19  ;;  %v953_v24 = vsub.f32 %v921_v52, %v945_v22 }
 0x41b   :  { %v966_v25 = vmul.f32 1.442695, %v952_v21  ;;  %v976_v29 = vsel %vm321_vm2, %v4360_v23, 0.0 }
 0x41c   :  { %v968_v30 = vmul.f32 1.442695, %v953_v24  ;;  %977 = vadd.xlane.f32.xlu0 %v976_v29  ;;  %v304_v44 = vpop.permute.xlu0 %303  ;;  %v4330_v24 = vld [vmem:[%s5131_s3 + $0x38] sm:$0xff]  }
 0x41d   :  { %4367 = vpow2.f32 %v966_v25  ;;  %v306_v42 = vpop.permute.xlu1 %305 }
 0x41e   :  { %4369 = vpow2.f32 %v968_v30 }
 0x41f   :  { %v4362_v31 = vpop.eup %4361 }
 0x420   :  { %v979_v33 = vsel %vm321_vm2, %v4362_v31, 0.0 }
 0x421   :  { %980 = vadd.xlane.f32.xlu1 %v979_v33  ;;  %v310_v45 = vpop.permute.xlu1 %309 }
 0x423   :  { %v4364_v34 = vpop.eup %4363 }
 0x424   :  { %v4366_v35 = vpop.eup %4365  ;;  %v982_v36 = vsel %vm321_vm2, %v4364_v34, 0.0 }
 0x425   :  { %983 = vadd.xlane.f32.xlu0 %v982_v36  ;;  %v985_v37 = vsel %vm321_vm2, %v4366_v35, 0.0  ;;  %v312_v47 = vpop.permute.xlu1 %311 }
 0x426   :  { %986 = vadd.xlane.f32.xlu1 %v985_v37 }
 0x427   :  { %v4714_v38 = vpop.eup %4367 }
 0x428   :  { %v4716_v39 = vpop.eup %4369  ;;  %v988_v40 = vsel %vm321_vm2, %v4714_v38, 0.0 }
 0x429   :  { %989 = vadd.xlane.f32.xlu0 %v988_v40  ;;  %v991_v41 = vsel %vm321_vm2, %v4716_v39, 0.0 }
 0x42a   :  { %992 = vadd.xlane.f32.xlu1 %v991_v41 }
 0x43b   :  { %317 = vrot.lane.b32.xlu1 %v4685_v15, %s4494_s26 }
 0x43f   :  { %315 = vrot.lane.b32.xlu0 %v4671_v12, %s4494_s26 }
 0x44d   :  { %v972_v46 = vpop.xlane.xlu0 %971 }
 0x44e   :  { %4371 = vrcp.f32 %v972_v46 }
 0x456   :  { %v975_v48 = vpop.xlane.xlu1 %974 }
 0x457   :  { %4373 = vrcp.f32 %v975_v48 }
 0x458   :  { %v4372_v49 = vpop.eup %4371 }
 0x459   :  { %v1002_v51 = vmul.f32 %v4372_v49, %v4356_v62 }
 0x45b   :  { %4085 = vmatmul.mubr.msk.f32.vlgmr.msra.gmra.mrb[10].mxu0 %vm321_vm2, %v1002_v51 }
 0x45c   :  { %4093 = vmatpush3.msra.mxu0 %v304_v44  ;;  %4094 = vmatprep.mubr.msk.f32.mxu0 %vm4491_vm1, %v4490_v16 }
 0x45d   :  { %4102 = vmatprep.subr.mxu0 %v4490_v16 }
 0x461   :  { %v4374_v15 = vpop.eup %4373 }
 0x462   :  { %v1003_v12 = vmul.f32 %v4374_v15, %v4358_v2 }
 0x464   :  { %4090 = vmatmul.mubr.msk.f32.vlgmr.msra.gmra.mrb[18].mxu1 %vm321_vm2, %v1003_v12 }
 0x465   :  { %4098 = vmatpush3.msra.mxu1 %v306_v42  ;;  %4099 = vmatprep.mubr.msk.f32.mxu1 %vm4491_vm1, %v4490_v16 }
 0x466   :  { %4107 = vmatprep.subr.mxu1 %v4490_v16 }
 0x4a9   :  { %v978_v52 = vpop.xlane.xlu0 %977 }
 0x4aa   :  { %4375 = vrcp.f32 %v978_v52 }
 0x4ae   :  { %v981_v53 = vpop.xlane.xlu1 %980 }
 0x4af   :  { %4377 = vrcp.f32 %v981_v53 }
 0x4b2   :  { %v984_v54 = vpop.xlane.xlu0 %983 }
 0x4b3   :  { %4379 = vrcp.f32 %v984_v54  ;;  %v987_v55 = vpop.xlane.xlu1 %986 }
 0x4b4   :  { %v4376_v56 = vpop.eup %4375  ;;  %4381 = vrcp.f32 %v987_v55  ;;  %v1634_v55 = vsub.s32 5, %v4582_v26 }
 0x4b5   :  { %v1004_v57 = vmul.f32 %v4376_v56, %v4360_v23 }
 0x4b6   :  { %v990_v58 = vpop.xlane.xlu0 %989  ;;  %v1635_v56 = vrot.slane %v4588_v28, %v1634_v55 }
 0x4b7   :  { %4383 = vrcp.f32 %v990_v58  ;;  %v993_v59 = vpop.xlane.xlu1 %992  ;;  %4095 = vmatmul.mubr.msk.f32.vlgmr.msra.gmra.mrb[12].mxu0 %vm321_vm2, %v1004_v57 }
 0x4b8   :  { %4385 = vrcp.f32 %v993_v59  ;;  %4103 = vmatpush3.msra.mxu0 %v310_v45  ;;  %4104 = vmatprep.mubr.msk.f32.mxu0 %vm4491_vm1, %v4490_v16 }
 0x4b9   :  { %v4378_v60 = vpop.eup %4377  ;;  %4112 = vmatprep.subr.mxu0 %v4490_v16 }
 0x4ba   :  { %v1005_v61 = vmul.f32 %v4378_v60, %v4362_v31  ;;  %v316_v4 = vpop.permute.xlu0 %315 }
 0x4bb   :  { %v318_v7 = vpop.permute.xlu1 %317 }
 0x4bc   :  { %4100 = vmatmul.mubr.msk.f32.vlgmr.msra.gmra.mrb[20].mxu1 %vm321_vm2, %v1005_v61 }
 0x4bd   :  { %v4380_v62 = vpop.eup %4379  ;;  %4108 = vmatpush3.msra.mxu1 %v312_v47  ;;  %4109 = vmatprep.mubr.msk.f32.mxu1 %vm4491_vm1, %v4490_v16 }
 0x4be   :  { %v4382_v63 = vpop.eup %4381  ;;  %v1006_v2 = vmul.f32 %v4380_v62, %v4364_v34  ;;  %4117 = vmatprep.subr.mxu1 %v4490_v16 }
 0x4bf   :  { %v1007_v3 = vmul.f32 %v4382_v63, %v4366_v35 }
 0x4c0   :  { %4105 = vmatmul.mubr.msk.f32.vlgmr.msra.gmra.mrb[14].mxu0 %vm321_vm2, %v1006_v2 }
 0x4c1   :  { %v4384_v5 = vpop.eup %4383  ;;  %4110 = vmatmul.mubr.msk.f32.vlgmr.msra.gmra.mrb[22].mxu1 %vm321_vm2, %v1007_v3  ;;  %4113 = vmatpush3.msra.mxu0 %v316_v4 }
 0x4c2   :  { %v4386_v8 = vpop.eup %4385  ;;  %v1008_v9 = vmul.f32 %v4384_v5, %v4714_v38  ;;  %4118 = vmatpush3.msra.mxu1 %v318_v7  ;;  %4114 = vmatprep.mubr.msk.f32.mxu0 %vm4491_vm1, %v4490_v16 }
 0x4c3   :  { %v1009_v10 = vmul.f32 %v4386_v8, %v4716_v39  ;;  %4119 = vmatprep.mubr.msk.f32.mxu1 %vm4491_vm1, %v4490_v16  ;;  %4122 = vmatprep.subr.bf16.mxu0 %v4490_v16 }
 0x4c4   :  { %4115 = vmatmul.mubr.msk.f32.vlgmr.msra.gmra.mrb[16].mxu0 %vm321_vm2, %v1008_v9  ;;  %4130 = vmatprep.subr.bf16.mxu1 %v4490_v16 }
 0x4c5   :  { %4120 = vmatmul.mubr.msk.f32.vlgmr.msra.gmra.mrb[24].mxu1 %vm321_vm2, %v1009_v10  ;;  %4126 = vmatprep.mubr.msk.bf16.mxu0 %vm4491_vm1, %v4490_v16 }
 0x4c6   :  { %4134 = vmatprep.mubr.msk.bf16.mxu1 %vm4491_vm1, %v4490_v16  ;;  %4123 = vmatpush3.bf16.msra.mxu0 %v4329_v20 }
 0x4c7   :  { %4124 = vmatprep.subr.bf16.mxu0 %v4490_v16 }
 0x4ca   :  { %4125 = vmatpush3.bf16.msra.mxu0 %v4330_v24 }
 0x4cb   :  { %4138 = vmatprep.subr.bf16.mxu0 %v4490_v16 }
 0x52e   :  { %v1079_v11 = vpop.f32.mrb[10].mxu0 }
 0x52f   :  { %v4086_v13 = vpop.f32.mrb[11].mxu0 }
 0x537   :  { %v1152_v14 = vpop.f32.mrb[18].mxu1 }
 0x538   :  { %v4091_v17 = vpop.f32.mrb[19].mxu1 }
 0x539   :  { %v4331_v17 = vld [vmem:[%s5132_s4] sm:$0xff]  }
 0x53a   :  { %4131 = vmatpush3.bf16.msra.mxu1 %v4331_v17 }
 0x53b   :  { %4132 = vmatprep.subr.bf16.mxu1 %v4490_v16 }
 0x58a   :  { %v1225_v18 = vpop.f32.mrb[12].mxu0 }
 0x58b   :  { %v4096_v19 = vpop.f32.mrb[13].mxu0 }
 0x58f   :  { %v1298_v21 = vpop.f32.mrb[20].mxu1 }
 0x590   :  { %v4293_v22 = vpack.i.bf16 %v1298_v21, %v1225_v18  ;;  %v4101_v23 = vpop.f32.mrb[21].mxu1  ;;  %v4332_v18 = vld [vmem:[%s5132_s4 + $0x8] sm:$0xff]  }
 0x591   :  { %4133 = vmatpush3.bf16.msra.mxu1 %v4332_v18 }
 0x592   :  { %4294 = vrot.lane.b32.xlu0 %v4293_v22, %s4489_s8  ;;  %4150 = vmatprep.subr.bf16.mxu1 %v4490_v16 }
 0x593   :  { %v1371_v25 = vpop.f32.mrb[14].mxu0 }
 0x594   :  { %v1444_v29 = vpop.f32.mrb[22].mxu1  ;;  %v4106_v30 = vpop.f32.mrb[15].mxu0 }
 0x595   :  { %v4298_v31 = vpack.i.bf16 %v1444_v29, %v1371_v25  ;;  %v4111_v33 = vpop.f32.mrb[23].mxu1  ;;  %v1722_v25 = vsub.s32 6, %v4582_v26 }
 0x596   :  { %v1728_v33 = vsub.s32 7, %v4582_v26  ;;  %v4349_v26 = vld [vmem:[%s5133_s5 + $0x30] sm:$0xff]  }
 0x597   :  { %4299 = vrot.lane.b32.xlu1 %v4298_v31, %s4495_s9  ;;  %v1517_v34 = vpop.f32.mrb[16].mxu0  ;;  %v1723_v30 = vrot.slane %v4588_v28, %v1722_v25 }
 0x598   :  { %v4116_v35 = vpop.f32.mrb[17].mxu0  ;;  %v1590_v36 = vpop.f32.mrb[24].mxu1 }
 0x599   :  { %v4303_v37 = vpack.i.bf16 %v1590_v36, %v1517_v34  ;;  %v4121_v38 = vpop.f32.mrb[25].mxu1 }
 0x59b   :  { %4304 = vrot.lane.b32.xlu0 %v4303_v37, %s4496_s10  ;;  %v1729_v37 = vrot.slane %v4588_v28, %v1728_v33  ;;  %v4335_v28 = vld [vmem:[%s5133_s5 + $0x10] sm:$0xff]  }
 0x604   :  { %v4295_v39 = vpop.permute.xlu0 %4294 }
 0x605   :  { %v4297_v41 = vunpack.i.h.bf16 %v4295_v39  ;;  %v4296_v42 = vunpack.i.l.bf16 %v4295_v39 }
 0x607   :  { %v1619_v47 = vsel %vm321_vm2, %v1152_v14, %v4297_v41  ;;  %v1618_v48 = vsel %vm321_vm2, %v1079_v11, %v4296_v42  ;;  %v4333_v42 = vld [vmem:[%s5133_s5] sm:$0xff]  }
 0x609   :  { %v4300_v40 = vpop.permute.xlu1 %4299 }
 0x60a   :  { %v4302_v44 = vunpack.i.h.bf16 %v4300_v40  ;;  %v4301_v45 = vunpack.i.l.bf16 %v4300_v40 }
 0x60c   :  { %v1622_v15 = vsel %vm1620_vm3, %v1619_v47, %v4302_v44  ;;  %v1621_v12 = vsel %vm1620_vm3, %v1618_v48, %v4301_v45  ;;  %v4334_v44 = vld [vmem:[%s5133_s5 + $0x8] sm:$0xff]   ;;  %v4336_v45 = vld [vmem:[%s5133_s5 + $0x18] sm:$0xff]  }
 0x60d   :  { %v4305_v46 = vpop.permute.xlu0 %4304 }
 0x60e   :  { %v4307_v49 = vunpack.i.h.bf16 %v4305_v46  ;;  %v4306_v51 = vunpack.i.l.bf16 %v4305_v46  ;;  %v3827_v46 = vld [vmem:[%s5130_s2] ss:$0 sm:$0xff] }
 0x610   :  { %v1625_v52 = vsel %vm1623_vm4, %v1622_v15, %v4307_v49  ;;  %v1624_v53 = vsel %vm1623_vm4, %v1621_v12, %v4306_v51 }
 0x611   :  { %v1626_v54 = vpack.c.bf16 %v1625_v52, %v1624_v53 }
 0x613   :  { %4127 = vmatmul.mubr.msk.bf16.vlgmr.msra.gmra.mrb[20].mxu0 %vm44_vm0, %v1626_v54 }
 0x614   :  { %4146 = vmatprep.mubr.msk.bf16.mxu0 %vm4491_vm1, %v4490_v16  ;;  %4139 = vmatpush3.bf16.msra.mxu0 %v4333_v42  ;;  %v4340_v42 = vld [vmem:[%s5131_s3 + $0x68] sm:$0xff]  }
 0x615   :  { %4140 = vmatprep.subr.bf16.mxu0 %v4490_v16 }
 0x618   :  { %4141 = vmatpush3.bf16.msra.mxu0 %v4334_v44 }
 0x619   :  { %4142 = vmatprep.subr.bf16.mxu0 %v4490_v16 }
 0x61c   :  { %4143 = vmatpush3.bf16.msra.mxu0 %v4335_v28 }
 0x61d   :  { %4144 = vmatprep.subr.bf16.mxu0 %v4490_v16 }
 0x620   :  { %4145 = vmatpush3.bf16.msra.mxu0 %v4336_v45 }
 0x621   :  { %4166 = vmatprep.subr.bf16.mxu0 %v4490_v16 }
 0x6e6   :  { %v1685_v57 = vpop.f32.mrb[20].mxu0 }
 0x6e7   :  { %v1686_v58 = vadd.f32 %v1685_v57, %v1635_v56  ;;  %v4128_v59 = vpop.f32.mrb[21].mxu0 }
 0x6e8   :  { %v1688_v60 = vpop.f32.mrb[22].mxu0 }
 0x6e9   :  { %v4783_v61 = vadd.f32 %v1686_v58, %v4548_v0  ;;  %v1689_v62 = vadd.f32 %v1688_v60, %v1635_v56  ;;  %v4129_v63 = vpop.f32.mrb[23].mxu0 }
 0x6eb   :  { %v4786_v2 = vadd.f32 %v1689_v62, %v4550_v1  ;;  %v1694_v3 = vsel %vm44_vm0, %v4783_v61, 0.0 }
 0x6ec   :  { %1695 = vadd.xlane.f32.xlu1 %v1694_v3 }
 0x6ed   :  { %v1697_v4 = vsel %vm44_vm0, %v4786_v2, 0.0 }
 0x6ee   :  { %1698 = vadd.xlane.f32.xlu0 %v1697_v4 }
 0x779   :  { %v1696_v5 = vpop.xlane.xlu1 %1695 }
 0x77a   :  { %v1700_v7 = vmul.f32 0.03125, %v1696_v5 }
 0x77b   :  { %v1699_v8 = vpop.xlane.xlu0 %1698 }
 0x77c   :  { %v1702_v9 = vsub.f32 %v4783_v61, %v1700_v7  ;;  %v1701_v0 = vmul.f32 0.03125, %v1699_v8 }
 0x77e   :  { %v1703_v10 = vsub.f32 %v4786_v2, %v1701_v0  ;;  %v1704_v11 = vmul.f32 %v1702_v9, %v1702_v9 }
 0x780   :  { %v1706_v1 = vsel %vm44_vm0, %v1704_v11, 0.0  ;;  %v1705_v13 = vmul.f32 %v1703_v10, %v1703_v10 }
 0x781   :  { %1707 = vadd.xlane.f32.xlu0 %v1706_v1  ;;  %v3831_v1 = vld [vmem:[%s5129_s1 + $0x8] ss:$0 sm:$0xff] }
 0x782   :  { %v1709_v14 = vsel %vm44_vm0, %v1705_v13, 0.0 }
 0x785   :  { %1710 = vadd.xlane.f32.xlu0 %v1709_v14 }
 0x80e   :  { %v1708_v19 = vpop.xlane.xlu0 %1707 }
 0x80f   :  { %v1712_v20 = vmul.f32 0.03125, %v1708_v19 }
 0x811   :  { %v1714_v21 = vadd.f32 1e-05, %v1712_v20 }
 0x812   :  { %v1711_v22 = vpop.xlane.xlu0 %1710 }
 0x813   :  { %4387 = vrsqrt.f32 %v1714_v21  ;;  %v1713_v23 = vmul.f32 0.03125, %v1711_v22 }
 0x815   :  { %v1715_v24 = vadd.f32 1e-05, %v1713_v23 }
 0x817   :  { %4389 = vrsqrt.f32 %v1715_v24 }
 0x81d   :  { %v4388_v29 = vpop.eup %4387 }
 0x81e   :  { %v1718_v31 = vmul.f32 %v4388_v29, %v1702_v9 }
 0x820   :  { %v1724_v35 = vmul.f32 %v1723_v30, %v1718_v31 }
 0x821   :  { %v4390_v34 = vpop.eup %4389 }
 0x822   :  { %v1719_v36 = vmul.f32 %v4390_v34, %v1703_v10  ;;  %v1730_v39 = vadd.f32 %v1729_v37, %v1724_v35 }
 0x824   :  { %v1725_v38 = vmul.f32 %v1723_v30, %v1719_v36 }
 0x826   :  { %v1731_v40 = vadd.f32 %v1729_v37, %v1725_v38 }
 0x828   :  { %v1732_v41 = vpack.c.bf16 %v1731_v40, %v1730_v39  ;;  %v4337_v39 = vld [vmem:[%s5131_s3 + $0x40] sm:$0xff]  }
 0x829   :  { %v4338_v40 = vld [vmem:[%s5131_s3 + $0x60] sm:$0xff]  }
 0x82a   :  { %4135 = vmatmul.mubr.msk.bf16.vlgmr.msra.gmra.mrb[28].mxu1 %vm44_vm0, %v1732_v41  ;;  %v4339_v41 = vld [vmem:[%s5131_s3 + $0x48] sm:$0xff]  }
 0x82b   :  { %4154 = vmatprep.mubr.msk.bf16.mxu1 %vm4491_vm1, %v4490_v16  ;;  %4151 = vmatpush3.bf16.msra.mxu1 %v4337_v39 }
 0x82c   :  { %4152 = vmatprep.subr.bf16.mxu1 %v4490_v16 }
 0x82f   :  { %4153 = vmatpush3.bf16.msra.mxu1 %v4339_v41 }
 0x830   :  { %4158 = vmatprep.subr.bf16.mxu1 %v4490_v16 }
 0x8fd   :  { %v1792_v47 = vpop.f32.mrb[28].mxu1 }
 0x8fe   :  { %v1793_v48 = vadd.f32 %v3827_v46, %v1792_v47  ;;  %v4136_v49 = vpop.f32.mrb[29].mxu1 }
 0x8ff   :  { %v1795_v51 = vpop.f32.mrb[30].mxu1  ;;  %v4873_v49 = vld [vmem:[%s5129_s1 + $0x10] sm:$0xff] }
 0x900   :  { %v1801_v15 = vmul.f32 0.044715, %v1793_v48  ;;  %v1796_v12 = vadd.f32 %v3827_v46, %v1795_v51  ;;  %v4137_v52 = vpop.f32.mrb[31].mxu1  ;;  %v1799_v7 = vmul.f32 0.5, %v1793_v48  ;;  %v1935_v51 = vrot.slane %v4873_v49, %v74_v27  ;;  %v4342_v27 = vld [vmem:[%s5131_s3 + $0x58] sm:$0xff]  }
 0x902   :  { %v1803_v53 = vmul.f32 %v1801_v15, %v1793_v48  ;;  %v1802_v54 = vmul.f32 0.044715, %v1796_v12  ;;  %v1800_v8 = vmul.f32 0.5, %v1796_v12 }
 0x904   :  { %v1805_v56 = vmul.f32 %v1803_v53, %v1793_v48  ;;  %v1804_v57 = vmul.f32 %v1802_v54, %v1796_v12  ;;  %v1941_v53 = vrot.slane %v4873_v49, %v80_v32  ;;  %v1953_v32 = vrot.slane %v4873_v49, %v91_v43 }
 0x906   :  { %v1807_v58 = vadd.f32 %v1805_v56, %v1793_v48  ;;  %v1806_v59 = vmul.f32 %v1804_v57, %v1796_v12 }
 0x908   :  { %v1809_v60 = vmul.f32 0.7978846, %v1807_v58  ;;  %v1808_v62 = vadd.f32 %v1806_v59, %v1796_v12 }
 0x90a   :  { %4391 = vtanh.f32 %v1809_v60  ;;  %v1810_v63 = vmul.f32 0.7978846, %v1808_v62  ;;  %v4341_v60 = vld [vmem:[%s5131_s3 + $0x50] sm:$0xff]  }
 0x90c   :  { %4393 = vtanh.f32 %v1810_v63 }
 0x914   :  { %v4392_v3 = vpop.eup %4391 }
 0x915   :  { %v1813_v4 = vadd.f32 1.0, %v4392_v3 }
 0x916   :  { %v4394_v5 = vpop.eup %4393 }
 0x917   :  { %v1814_v9 = vadd.f32 1.0, %v4394_v5  ;;  %v1815_v0 = vmul.f32 %v1813_v4, %v1799_v7 }
 0x919   :  { %v1816_v10 = vmul.f32 %v1814_v9, %v1800_v8 }
 0x91b   :  { %v1817_v11 = vpack.c.bf16 %v1816_v10, %v1815_v0 }
 0x91d   :  { %4147 = vmatmul.mubr.msk.bf16.vlgmr.msra.gmra.mrb[24].mxu0 %vm1854_vm5, %v1817_v11 }
 0x91e   :  { %4170 = vmatprep.mubr.msk.bf16.mxu0 %vm4491_vm1, %v4490_v16  ;;  %4167 = vmatpush3.bf16.msra.mxu0 %v4338_v40 }
 0x91f   :  { %4168 = vmatprep.subr.bf16.mxu0 %v4490_v16 }
 0x922   :  { %4169 = vmatpush3.bf16.msra.mxu0 %v4340_v42 }
 0x923   :  { %4184 = vmatprep.subr.mxu0 %v4490_v16 }
 0x9f0   :  { %v1892_v13 = vpop.f32.mrb[24].mxu0 }
 0x9f1   :  { %v1893_v14 = vadd.f32 %v3831_v1, %v1892_v13  ;;  %v4148_v17 = vpop.f32.mrb[25].mxu0 }
 0x9f2   :  { %v1895_v18 = vpop.f32.mrb[26].mxu0 }
 0x9f3   :  { %v4841_v19 = vadd.f32 %v1893_v14, %v4783_v61  ;;  %v1896_v20 = vadd.f32 %v3831_v1, %v1895_v18  ;;  %v4149_v21 = vpop.f32.mrb[27].mxu0  ;;  %v2018_v1 = vrot.slane %v4873_v49, %v156_v50 }
 0x9f5   :  { %v4844_v22 = vadd.f32 %v1896_v20, %v4786_v2  ;;  %v1906_v23 = vsel %vm44_vm0, %v4841_v19, 0.0 }
 0x9f6   :  { %1907 = vadd.xlane.f32.xlu1 %v1906_v23 }
 0x9f7   :  { %v1909_v24 = vsel %vm44_vm0, %v4844_v22, 0.0 }
 0x9f8   :  { %1910 = vadd.xlane.f32.xlu0 %v1909_v24 }
 0xa83   :  { %v1908_v29 = vpop.xlane.xlu1 %1907 }
 0xa84   :  { %v1912_v30 = vmul.f32 0.03125, %v1908_v29 }
 0xa85   :  { %v1911_v31 = vpop.xlane.xlu0 %1910 }
 0xa86   :  { %v1914_v34 = vsub.f32 %v4841_v19, %v1912_v30  ;;  %v1913_v61 = vmul.f32 0.03125, %v1911_v31 }
 0xa88   :  { %v1915_v35 = vsub.f32 %v4844_v22, %v1913_v61  ;;  %v1916_v36 = vmul.f32 %v1914_v34, %v1914_v34 }
 0xa8a   :  { %v1918_v2 = vsel %vm44_vm0, %v1916_v36, 0.0  ;;  %v1917_v37 = vmul.f32 %v1915_v35, %v1915_v35 }
 0xa8b   :  { %1919 = vadd.xlane.f32.xlu1 %v1918_v2 }
 0xa8c   :  { %v1921_v38 = vsel %vm44_vm0, %v1917_v37, 0.0 }
 0xa8d   :  { %1922 = vadd.xlane.f32.xlu0 %v1921_v38 }
 0xb18   :  { %v1920_v44 = vpop.xlane.xlu1 %1919 }
 0xb19   :  { %v1924_v28 = vmul.f32 0.03125, %v1920_v44 }
 0xb1a   :  { %v1923_v45 = vpop.xlane.xlu0 %1922 }
 0xb1b   :  { %v1926_v46 = vadd.f32 1e-05, %v1924_v28  ;;  %v1925_v47 = vmul.f32 0.03125, %v1923_v45 }
 0xb1d   :  { %4395 = vrsqrt.f32 %v1926_v46  ;;  %v1927_v48 = vadd.f32 1e-05, %v1925_v47 }
 0xb1f   :  { %4397 = vrsqrt.f32 %v1927_v48 }
 0xb27   :  { %v4396_v15 = vpop.eup %4395 }
 0xb28   :  { %v1930_v12 = vmul.f32 %v4396_v15, %v1914_v34 }
 0xb29   :  { %v4398_v52 = vpop.eup %4397 }
 0xb2a   :  { %v1936_v54 = vmul.f32 %v1935_v51, %v1930_v12  ;;  %v1931_v56 = vmul.f32 %v4398_v52, %v1915_v35  ;;  %v2080_v35 = vrot.slane %v4873_v49, %v218_v6 }
 0xb2c   :  { %v1937_v57 = vmul.f32 %v1935_v51, %v1931_v56  ;;  %v1942_v58 = vadd.f32 %v1941_v53, %v1936_v54 }
 0xb2e   :  { %v1943_v59 = vadd.f32 %v1941_v53, %v1937_v57 }
 0xb30   :  { %v1944_v62 = vpack.c.bf16 %v1943_v59, %v1942_v58 }
 0xb32   :  { %4155 = vmatmul.mubr.msk.bf16.vlgmr.msra.gmra.mrb[32].mxu1 %vm44_vm0, %v1944_v62  ;;  %4171 = vmatmul.mubr.msk.bf16.vlgmr.msra.gmra.mrb[28].mxu0 %vm44_vm0, %v1944_v62 }
 0xb33   :  { %4159 = vmatpush3.bf16.msra.mxu1 %v4341_v60  ;;  %4162 = vmatprep.mubr.msk.bf16.mxu1 %vm4491_vm1, %v4490_v16 }
 0xb34   :  { %4160 = vmatprep.subr.bf16.mxu1 %v4490_v16  ;;  %4186 = vmatprep.mubr.msk.f32.mxu0 %vm4491_vm1, %v4490_v16 }
 0xb37   :  { %4161 = vmatpush3.bf16.msra.mxu1 %v4342_v27 }
 0xb38   :  { %4174 = vmatprep.subr.mxu1 %v4490_v16 }
 0xb3a   :  { %4163 = vmatmul.mubr.msk.bf16.vlgmr.msra.gmra.mrb[36].mxu1 %vm44_vm0, %v1944_v62 }
 0xb3b   :  { %4176 = vmatprep.mubr.msk.f32.mxu1 %vm4491_vm1, %v4490_v16 }
 0xc05   :  { %v2003_v63 = vpop.f32.mrb[32].mxu1  ;;  %v4901_v3 = vpop.f32.mrb[28].mxu0 }
 0xc06   :  { %v2004_v4 = vadd.f32 %v2003_v63, %v1953_v32  ;;  %v4156_v5 = vpop.f32.mrb[33].mxu1  ;;  %v4172_v7 = vpop.f32.mrb[29].mxu0  ;;  %v4959_v38 = vadd.f32 %v4901_v3, %v2080_v35 }
 0xc07   :  { %v2006_v8 = vpop.f32.mrb[34].mxu1  ;;  %v2130_v9 = vpop.f32.mrb[30].mxu0 }
 0xc08   :  { %v2007_v0 = vadd.f32 %v2006_v8, %v1953_v32  ;;  %v4173_v10 = vpop.f32.mrb[31].mxu0  ;;  %2136 = vrot.lane.b32.xlu1 %v2004_v4, %s4493_s25  ;;  %v4157_v11 = vpop.f32.mrb[35].mxu1  ;;  %v4954_v2 = vadd.f32 %v2130_v9, %v2080_v35 }
 0xc0a   :  { %2142 = vrot.lane.b32.xlu0 %v2007_v0, %s4492_s24 }
 0xc0c   :  { %2140 = vrot.lane.b32.xlu1 %v2004_v4, %s4492_s24 }
 0xc0d   :  { %v2065_v43 = vpop.f32.mrb[36].mxu1 }
 0xc0e   :  { %v2066_v13 = vadd.f32 %v2065_v43, %v2018_v1  ;;  %v4164_v14 = vpop.f32.mrb[37].mxu1 }
 0xc0f   :  { %v2068_v17 = vpop.f32.mrb[38].mxu1 }
 0xc10   :  { %v2069_v18 = vadd.f32 %v2068_v17, %v2018_v1  ;;  %2138 = vrot.lane.b32.xlu1 %v2007_v0, %s4493_s25  ;;  %v4165_v20 = vpop.f32.mrb[39].mxu1  ;;  %4175 = vmatpush3.xpose.msk.msra.mxu1 %vm321_vm2, %v2066_v13 }
 0xc11   :  { %4179 = vmatprep.subr.mxu1 %v4490_v16 }
 0xc12   :  { %2152 = vrot.lane.b32.xlu0 %v2069_v18, %s4493_s25 }
 0xc13   :  { %4177 = vmatmul.mubr.msk.f32.vlgmr.msra.gmra.mrb[26].mxu1 %vm321_vm2, %v2004_v4 }
 0xc14   :  { %2150 = vrot.lane.b32.xlu1 %v2066_v13, %s4493_s25  ;;  %4180 = vmatpush3.xpose.msk.msra.mxu1 %vm321_vm2, %v2069_v18 }
 0xc15   :  { %4181 = vmatprep.mubr.msk.f32.mxu1 %vm4491_vm1, %v4490_v16  ;;  %4189 = vmatprep.subr.mxu1 %v4490_v16 }
 0xc16   :  { %2156 = vrot.lane.b32.xlu0 %v2069_v18, %s4492_s24 }
 0xc17   :  { %4182 = vmatmul.mubr.msk.f32.vlgmr.msra.gmra.mrb[40].mxu1 %vm321_vm2, %v2007_v0 }
 0xc18   :  { %2154 = vrot.lane.b32.xlu1 %v2066_v13, %s4492_s24  ;;  %4191 = vmatprep.mubr.msk.f32.mxu1 %vm4491_vm1, %v4490_v16 }
 0xc1a   :  { %2160 = vrot.lane.b32.xlu0 %v2069_v18, %s4494_s26 }
 0xc1c   :  { %2158 = vrot.lane.b32.xlu1 %v2066_v13, %s4494_s26 }
 0xc1e   :  { %2146 = vrot.lane.b32.xlu0 %v2007_v0, %s4494_s26 }
 0xc20   :  { %2144 = vrot.lane.b32.xlu1 %v2004_v4, %s4494_s26 }
 0xc7a   :  { %v2137_v50 = vpop.permute.xlu1 %2136 }
 0xc7c   :  { %v2143_v23 = vpop.permute.xlu0 %2142 }
 0xc7e   :  { %v2141_v21 = vpop.permute.xlu1 %2140 }
 0xc82   :  { %v2139_v24 = vpop.permute.xlu1 %2138 }
 0xc84   :  { %v2153_v29 = vpop.permute.xlu0 %2152 }
 0xc85   :  { %4190 = vmatpush3.xpose.msk.msra.mxu1 %vm321_vm2, %v2153_v29 }
 0xc86   :  { %v2151_v30 = vpop.permute.xlu1 %2150  ;;  %4199 = vmatprep.subr.mxu1 %v4490_v16 }
 0xc87   :  { %4185 = vmatpush3.xpose.msk.msra.mxu0 %vm321_vm2, %v2151_v30 }
 0xc88   :  { %v2157_v31 = vpop.permute.xlu0 %2156  ;;  %4192 = vmatmul.mubr.msk.f32.vlgmr.msra.gmra.mrb[42].mxu1 %vm321_vm2, %v2139_v24  ;;  %4194 = vmatprep.subr.mxu0 %v4490_v16 }
 0xc89   :  { %4200 = vmatpush3.xpose.msk.msra.mxu1 %vm321_vm2, %v2157_v31  ;;  %4201 = vmatprep.mubr.msk.f32.mxu1 %vm4491_vm1, %v4490_v16 }
 0xc8a   :  { %4187 = vmatmul.mubr.msk.f32.vlgmr.msra.gmra.mrb[18].mxu0 %vm321_vm2, %v2137_v50  ;;  %v2155_v34 = vpop.permute.xlu1 %2154  ;;  %4209 = vmatprep.subr.mxu1 %v4490_v16 }
 0xc8b   :  { %4195 = vmatpush3.xpose.msk.msra.mxu0 %vm321_vm2, %v2155_v34  ;;  %4196 = vmatprep.mubr.msk.f32.mxu0 %vm4491_vm1, %v4490_v16 }
 0xc8c   :  { %v2161_v61 = vpop.permute.xlu0 %2160  ;;  %4202 = vmatmul.mubr.msk.f32.vlgmr.msra.gmra.mrb[44].mxu1 %vm321_vm2, %v2143_v23  ;;  %4204 = vmatprep.subr.mxu0 %v4490_v16 }
 0xc8d   :  { %4210 = vmatpush3.xpose.msk.msra.mxu1 %vm321_vm2, %v2161_v61  ;;  %4211 = vmatprep.mubr.msk.f32.mxu1 %vm4491_vm1, %v4490_v16 }
 0xc8e   :  { %4197 = vmatmul.mubr.msk.f32.vlgmr.msra.gmra.mrb[32].mxu0 %vm321_vm2, %v2141_v21  ;;  %v2159_v36 = vpop.permute.xlu1 %2158  ;;  %4219 = vmatprep.subr.mxu1 %v4490_v16 }
 0xc8f   :  { %4205 = vmatpush3.xpose.msk.msra.mxu0 %vm321_vm2, %v2159_v36  ;;  %4206 = vmatprep.mubr.msk.f32.mxu0 %vm4491_vm1, %v4490_v16 }
 0xc90   :  { %v2147_v37 = vpop.permute.xlu0 %2146  ;;  %4214 = vmatprep.subr.mxu0 %v4490_v16 }
 0xc91   :  { %4212 = vmatmul.mubr.msk.f32.vlgmr.msra.gmra.mrb[46].mxu1 %vm321_vm2, %v2147_v37 }
 0xc92   :  { %4220 = vmatpush3.msra.mxu1 %v4954_v2  ;;  %v2145_v6 = vpop.permute.xlu1 %2144  ;;  %4221 = vmatprep.mubr.msk.f32.mxu1 %vm4491_vm1, %v4490_v16 }
 0xc93   :  { %4207 = vmatmul.mubr.msk.f32.vlgmr.msra.gmra.mrb[34].mxu0 %vm321_vm2, %v2145_v6  ;;  %4229 = vmatprep.subr.mxu1 %v4490_v16 }
 0xc94   :  { %4215 = vmatpush3.msra.mxu0 %v4959_v38  ;;  %4216 = vmatprep.mubr.msk.f32.mxu0 %vm4491_vm1, %v4490_v16 }
 0xc95   :  { %4224 = vmatprep.subr.mxu0 %v4490_v16 }
 0xce6   :  { %v2252_v39 = vpop.f32.mrb[26].mxu1 }
 0xce7   :  { %v2774_v40 = vmul.f32 0.17677669, %v2252_v39  ;;  %v4178_v41 = vpop.f32.mrb[27].mxu1 }
 0xce9   :  { %v2782_v42 = vsel %vm321_vm2, %v2774_v40, -inf }
 0xcea   :  { %2783 = vmax.xlane.f32.xlu1 %v2782_v42  ;;  %v2326_v44 = vpop.f32.mrb[40].mxu1 }
 0xceb   :  { %v2775_v28 = vmul.f32 0.17677669, %v2326_v44  ;;  %v4183_v45 = vpop.f32.mrb[41].mxu1 }
 0xced   :  { %v2785_v46 = vsel %vm321_vm2, %v2775_v28, -inf }
 0xcee   :  { %2786 = vmax.xlane.f32.xlu0 %v2785_v46 }
 0xd5b   :  { %v2474_v47 = vpop.f32.mrb[42].mxu1 }
 0xd5c   :  { %v4193_v48 = vpop.f32.mrb[43].mxu1  ;;  %v2777_v53 = vmul.f32 0.17677669, %v2474_v47 }
 0xd5d   :  { %v2400_v51 = vpop.f32.mrb[18].mxu0 }
 0xd5e   :  { %v2776_v15 = vmul.f32 0.17677669, %v2400_v51  ;;  %v4188_v12 = vpop.f32.mrb[19].mxu0  ;;  %v2791_v32 = vsel %vm321_vm2, %v2777_v53, -inf }
 0xd5f   :  { %v2622_v52 = vpop.f32.mrb[44].mxu1 }
 0xd60   :  { %v4203_v54 = vpop.f32.mrb[45].mxu1  ;;  %v2788_v56 = vsel %vm321_vm2, %v2776_v15, -inf  ;;  %v2779_v60 = vmul.f32 0.17677669, %v2622_v52 }
 0xd61   :  { %v2548_v57 = vpop.f32.mrb[32].mxu0  ;;  %2789 = vmax.xlane.f32.xlu0 %v2788_v56 }
 0xd62   :  { %v2778_v58 = vmul.f32 0.17677669, %v2548_v57  ;;  %v4198_v59 = vpop.f32.mrb[33].mxu0  ;;  %v2797_v8 = vsel %vm321_vm2, %v2779_v60, -inf }
 0xd64   :  { %v2770_v62 = vpop.f32.mrb[46].mxu1  ;;  %v2794_v27 = vsel %vm321_vm2, %v2778_v58, -inf }
 0xd65   :  { %2795 = vmax.xlane.f32.xlu1 %v2794_v27  ;;  %2792 = vmax.xlane.f32.xlu0 %v2791_v32  ;;  %v4213_v63 = vpop.f32.mrb[47].mxu1  ;;  %v2781_v7 = vmul.f32 0.17677669, %v2770_v62 }
 0xd66   :  { %v2696_v3 = vpop.f32.mrb[34].mxu0 }
 0xd67   :  { %v2780_v4 = vmul.f32 0.17677669, %v2696_v3  ;;  %v4208_v5 = vpop.f32.mrb[35].mxu0  ;;  %v2803_v0 = vsel %vm321_vm2, %v2781_v7, -inf }
 0xd69   :  { %2798 = vmax.xlane.f32.xlu0 %v2797_v8  ;;  %v2800_v9 = vsel %vm321_vm2, %v2780_v4, -inf }
 0xd6a   :  { %2801 = vmax.xlane.f32.xlu1 %v2800_v9 }
 0xd6d   :  { %2804 = vmax.xlane.f32.xlu0 %v2803_v0 }
 0xd77   :  { %v2784_v1 = vpop.xlane.xlu1 %2783 }
 0xd78   :  { %v2806_v13 = vsub.f32 %v2774_v40, %v2784_v1 }
 0xd7a   :  { %v2814_v14 = vmul.f32 1.442695, %v2806_v13 }
 0xd7b   :  { %2164 = vrot.lane.b32.xlu1 %v4959_v38, %s4493_s25  ;;  %v2787_v10 = vpop.xlane.xlu0 %2786 }
 0xd7c   :  { %v2807_v11 = vsub.f32 %v2775_v28, %v2787_v10 }
 0xd7e   :  { %v2816_v43 = vmul.f32 1.442695, %v2807_v11 }
 0xd7f   :  { %2170 = vrot.lane.b32.xlu1 %v4959_v38, %s4492_s24 }
 0xd80   :  { %4399 = vpow2.f32 %v2816_v43 }
 0xd81   :  { %4401 = vpow2.f32 %v2814_v14 }
 0xd83   :  { %2172 = vrot.lane.b32.xlu1 %v4954_v2, %s4492_s24  ;;  %2166 = vrot.lane.b32.xlu0 %v4954_v2, %s4493_s25 }
 0xd8a   :  { %v4400_v17 = vpop.eup %4399 }
 0xd8b   :  { %v2833_v18 = vsel %vm321_vm2, %v4400_v17, 0.0  ;;  %v4402_v20 = vpop.eup %4401 }
 0xd8c   :  { %v2830_v50 = vsel %vm321_vm2, %v4402_v20, 0.0 }
 0xda2   :  { %2834 = vadd.xlane.f32.xlu0 %v2833_v18 }
 0xda7   :  { %2831 = vadd.xlane.f32.xlu1 %v2830_v50 }
 0xdee   :  { %v2790_v21 = vpop.xlane.xlu0 %2789 }
 0xdef   :  { %v2808_v23 = vsub.f32 %v2776_v15, %v2790_v21 }
 0xdf1   :  { %v2818_v24 = vmul.f32 1.442695, %v2808_v23 }
 0xdf2   :  { %v2796_v29 = vpop.xlane.xlu1 %2795  ;;  %v2793_v30 = vpop.xlane.xlu0 %2792 }
 0xdf3   :  { %4403 = vpow2.f32 %v2818_v24  ;;  %v2810_v31 = vsub.f32 %v2778_v58, %v2796_v29  ;;  %v2809_v34 = vsub.f32 %v2777_v53, %v2793_v30 }
 0xdf5   :  { %v2822_v61 = vmul.f32 1.442695, %v2810_v31  ;;  %v2820_v35 = vmul.f32 1.442695, %v2809_v34 }
 0xdf6   :  { %v2799_v36 = vpop.xlane.xlu0 %2798 }
 0xdf7   :  { %4405 = vpow2.f32 %v2822_v61  ;;  %v2811_v37 = vsub.f32 %v2779_v60, %v2799_v36  ;;  %v2802_v6 = vpop.xlane.xlu1 %2801  ;;  %v4343_v36 = vld [vmem:[%s5131_s3 + $0x70] sm:$0xff]  }
 0xdf8   :  { %4407 = vpow2.f32 %v2820_v35  ;;  %v2812_v39 = vsub.f32 %v2780_v4, %v2802_v6 }
 0xdf9   :  { %v2824_v40 = vmul.f32 1.442695, %v2811_v37 }
 0xdfa   :  { %v2826_v41 = vmul.f32 1.442695, %v2812_v39  ;;  %v2805_v42 = vpop.xlane.xlu0 %2804  ;;  %v4344_v39 = vld [vmem:[%s5131_s3 + $0x78] sm:$0xff]  }
 0xdfb   :  { %4409 = vpow2.f32 %v2824_v40  ;;  %v2813_v44 = vsub.f32 %v2781_v7, %v2805_v42  ;;  %v2165_v58 = vpop.permute.xlu1 %2164 }
 0xdfc   :  { %4411 = vpow2.f32 %v2826_v41 }
 0xdfd   :  { %v4404_v28 = vpop.eup %4403  ;;  %v2828_v45 = vmul.f32 1.442695, %v2813_v44 }
 0xdfe   :  { %v2836_v46 = vsel %vm321_vm2, %v4404_v28, 0.0  ;;  %v2167_v60 = vpop.permute.xlu0 %2166 }
 0xdff   :  { %4413 = vpow2.f32 %v2828_v45  ;;  %2837 = vadd.xlane.f32.xlu1 %v2836_v46  ;;  %v2171_v59 = vpop.permute.xlu1 %2170 }
 0xe01   :  { %v4406_v47 = vpop.eup %4405 }
 0xe02   :  { %v4408_v48 = vpop.eup %4407  ;;  %v2842_v51 = vsel %vm321_vm2, %v4406_v47, 0.0 }
 0xe03   :  { %2843 = vadd.xlane.f32.xlu1 %v2842_v51  ;;  %v2839_v15 = vsel %vm321_vm2, %v4408_v48, 0.0  ;;  %v2173_v27 = vpop.permute.xlu1 %2172 }
 0xe04   :  { %2840 = vadd.xlane.f32.xlu0 %v2839_v15 }
 0xe05   :  { %v4410_v12 = vpop.eup %4409 }
 0xe06   :  { %v4991_v52 = vpop.eup %4411  ;;  %v2845_v53 = vsel %vm321_vm2, %v4410_v12, 0.0 }
 0xe07   :  { %v2848_v54 = vsel %vm321_vm2, %v4991_v52, 0.0 }
 0xe08   :  { %2846 = vadd.xlane.f32.xlu0 %v2845_v53  ;;  %2849 = vadd.xlane.f32.xlu1 %v2848_v54 }
 0xe09   :  { %v4996_v56 = vpop.eup %4413 }
 0xe0a   :  { %v2851_v57 = vsel %vm321_vm2, %v4996_v56, 0.0 }
 0xe0c   :  { %2852 = vadd.xlane.f32.xlu0 %v2851_v57 }
 0xe19   :  { %2176 = vrot.lane.b32.xlu1 %v4959_v38, %s4494_s26 }
 0xe22   :  { %2178 = vrot.lane.b32.xlu0 %v4954_v2, %s4494_s26 }
 0xe2f   :  { %v2835_v62 = vpop.xlane.xlu0 %2834 }
 0xe30   :  { %4415 = vrcp.f32 %v2835_v62 }
 0xe34   :  { %v2832_v32 = vpop.xlane.xlu1 %2831 }
 0xe35   :  { %4417 = vrcp.f32 %v2832_v32 }
 0xe3a   :  { %v4416_v63 = vpop.eup %4415 }
 0xe3b   :  { %v2863_v3 = vmul.f32 %v4416_v63, %v4400_v17 }
 0xe3d   :  { %4222 = vmatmul.mubr.msk.f32.vlgmr.msra.gmra.mrb[48].mxu1 %vm321_vm2, %v2863_v3 }
 0xe3e   :  { %4230 = vmatpush3.msra.mxu1 %v2167_v60  ;;  %4231 = vmatprep.mubr.msk.f32.mxu1 %vm4491_vm1, %v4490_v16 }
 0xe3f   :  { %v4418_v38 = vpop.eup %4417  ;;  %4239 = vmatprep.subr.mxu1 %v4490_v16 }
 0xe40   :  { %v2862_v2 = vmul.f32 %v4418_v38, %v4402_v20 }
 0xe42   :  { %4217 = vmatmul.mubr.msk.f32.vlgmr.msra.gmra.mrb[36].mxu0 %vm321_vm2, %v2862_v2 }
 0xe43   :  { %4225 = vmatpush3.msra.mxu0 %v2165_v58  ;;  %4226 = vmatprep.mubr.msk.f32.mxu0 %vm4491_vm1, %v4490_v16 }
 0xe44   :  { %4234 = vmatprep.subr.mxu0 %v4490_v16 }
 0xe8c   :  { %v2838_v4 = vpop.xlane.xlu1 %2837 }
 0xe8d   :  { %4419 = vrcp.f32 %v2838_v4 }
 0xe90   :  { %v2844_v5 = vpop.xlane.xlu1 %2843 }
 0xe91   :  { %4421 = vrcp.f32 %v2844_v5  ;;  %v2841_v7 = vpop.xlane.xlu0 %2840  ;;  %v3493_v5 = vrot.slane %v4873_v49, %v1634_v55 }
 0xe92   :  { %4423 = vrcp.f32 %v2841_v7 }
 0xe95   :  { %v2847_v8 = vpop.xlane.xlu0 %2846  ;;  %v2850_v9 = vpop.xlane.xlu1 %2849 }
 0xe96   :  { %4425 = vrcp.f32 %v2847_v8 }
 0xe97   :  { %v4420_v0 = vpop.eup %4419  ;;  %4427 = vrcp.f32 %v2850_v9 }
 0xe98   :  { %v2864_v10 = vmul.f32 %v4420_v0, %v4404_v28 }
 0xe99   :  { %v2853_v11 = vpop.xlane.xlu0 %2852  ;;  %v2177_v17 = vpop.permute.xlu1 %2176 }
 0xe9a   :  { %4429 = vrcp.f32 %v2853_v11  ;;  %4227 = vmatmul.mubr.msk.f32.vlgmr.msra.gmra.mrb[38].mxu0 %vm321_vm2, %v2864_v10 }
 0xe9b   :  { %v4422_v1 = vpop.eup %4421  ;;  %4235 = vmatpush3.msra.mxu0 %v2171_v59  ;;  %4236 = vmatprep.mubr.msk.f32.mxu0 %vm4491_vm1, %v4490_v16 }
 0xe9c   :  { %v4424_v43 = vpop.eup %4423  ;;  %v2866_v13 = vmul.f32 %v4422_v1, %v4406_v47  ;;  %4244 = vmatprep.subr.mxu0 %v4490_v16 }
 0xe9d   :  { %v2865_v14 = vmul.f32 %v4424_v43, %v4408_v48  ;;  %v2179_v23 = vpop.permute.xlu0 %2178 }
 0xe9e   :  { %4237 = vmatmul.mubr.msk.f32.vlgmr.msra.gmra.mrb[40].mxu0 %vm321_vm2, %v2866_v13 }
 0xe9f   :  { %4232 = vmatmul.mubr.msk.f32.vlgmr.msra.gmra.mrb[50].mxu1 %vm321_vm2, %v2865_v14  ;;  %4245 = vmatpush3.msra.mxu0 %v2177_v17 }
 0xea0   :  { %v4426_v18 = vpop.eup %4425  ;;  %4240 = vmatpush3.msra.mxu1 %v2173_v27  ;;  %4241 = vmatprep.mubr.msk.f32.mxu1 %vm4491_vm1, %v4490_v16 }
 0xea1   :  { %v4428_v20 = vpop.eup %4427  ;;  %v2867_v50 = vmul.f32 %v4426_v18, %v4410_v12  ;;  %4249 = vmatprep.subr.mxu1 %v4490_v16  ;;  %4246 = vmatprep.mubr.msk.f32.mxu0 %vm4491_vm1, %v4490_v16 }
 0xea2   :  { %v2868_v21 = vmul.f32 %v4428_v20, %v4991_v52  ;;  %4254 = vmatprep.subr.bf16.mxu0 %v4490_v16 }
 0xea3   :  { %4242 = vmatmul.mubr.msk.f32.vlgmr.msra.gmra.mrb[52].mxu1 %vm321_vm2, %v2867_v50 }
 0xea4   :  { %v4430_v24 = vpop.eup %4429  ;;  %4250 = vmatpush3.msra.mxu1 %v2179_v23  ;;  %4247 = vmatmul.mubr.msk.f32.vlgmr.msra.gmra.mrb[42].mxu0 %vm321_vm2, %v2868_v21 }
 0xea5   :  { %v2869_v29 = vmul.f32 %v4430_v24, %v4996_v56  ;;  %4251 = vmatprep.mubr.msk.f32.mxu1 %vm4491_vm1, %v4490_v16  ;;  %4258 = vmatprep.mubr.msk.bf16.mxu0 %vm4491_vm1, %v4490_v16 }
 0xea6   :  { %4262 = vmatprep.subr.bf16.mxu1 %v4490_v16  ;;  %4255 = vmatpush3.bf16.msra.mxu0 %v4343_v36 }
 0xea7   :  { %4252 = vmatmul.mubr.msk.f32.vlgmr.msra.gmra.mrb[54].mxu1 %vm321_vm2, %v2869_v29  ;;  %4256 = vmatprep.subr.bf16.mxu0 %v4490_v16  ;;  %v4345_v29 = vld [vmem:[%s5132_s4 + $0x10] sm:$0xff]  }
 0xea8   :  { %4266 = vmatprep.mubr.msk.bf16.mxu1 %vm4491_vm1, %v4490_v16  ;;  %4263 = vmatpush3.bf16.msra.mxu1 %v4345_v29 }
 0xea9   :  { %4264 = vmatprep.subr.bf16.mxu1 %v4490_v16 }
 0xeaa   :  { %4257 = vmatpush3.bf16.msra.mxu0 %v4344_v39  ;;  %v3581_v39 = vrot.slane %v4873_v49, %v1722_v25  ;;  %v4348_v25 = vld [vmem:[%s5133_s5 + $0x28] sm:$0xff]  }
 0xeab   :  { %4270 = vmatprep.subr.bf16.mxu0 %v4490_v16 }
 0xf10   :  { %v3012_v30 = vpop.f32.mrb[48].mxu1 }
 0xf11   :  { %v4223_v31 = vpop.f32.mrb[49].mxu1 }
 0xf15   :  { %v2939_v34 = vpop.f32.mrb[36].mxu0 }
 0xf16   :  { %v4218_v61 = vpop.f32.mrb[37].mxu0 }
 0xf6d   :  { %v3085_v35 = vpop.f32.mrb[38].mxu0 }
 0xf6e   :  { %v4228_v37 = vpop.f32.mrb[39].mxu0 }
 0xf71   :  { %v3231_v6 = vpop.f32.mrb[40].mxu0 }
 0xf72   :  { %v3158_v40 = vpop.f32.mrb[50].mxu1  ;;  %v4238_v41 = vpop.f32.mrb[41].mxu0 }
 0xf73   :  { %v4308_v42 = vpack.i.bf16 %v3158_v40, %v3085_v35  ;;  %v4233_v44 = vpop.f32.mrb[51].mxu1 }
 0xf75   :  { %4309 = vrot.lane.b32.xlu1 %v4308_v42, %s4489_s8 }
 0xf76   :  { %v3304_v28 = vpop.f32.mrb[52].mxu1 }
 0xf77   :  { %v4313_v45 = vpack.i.bf16 %v3304_v28, %v3231_v6  ;;  %v4243_v46 = vpop.f32.mrb[53].mxu1  ;;  %v3377_v47 = vpop.f32.mrb[42].mxu0  ;;  %v3587_v28 = vrot.slane %v4873_v49, %v1728_v33  ;;  %v4350_v33 = vld [vmem:[%s5133_s5 + $0x38] sm:$0xff]   ;;  %v3896_v49 = vld [vmem:[%s5130_s2 + $0x1] ss:$0 sm:$0xff] }
 0xf78   :  { %v4248_v48 = vpop.f32.mrb[43].mxu0 }
 0xf79   :  { %4314 = vrot.lane.b32.xlu0 %v4313_v45, %s4495_s9 }
 0xf7a   :  { %v3450_v51 = vpop.f32.mrb[54].mxu1 }
 0xf7b   :  { %v4318_v15 = vpack.i.bf16 %v3450_v51, %v3377_v47  ;;  %v4253_v12 = vpop.f32.mrb[55].mxu1  ;;  %v4347_v51 = vld [vmem:[%s5133_s5 + $0x20] sm:$0xff]  }
 0xf7d   :  { %4319 = vrot.lane.b32.xlu1 %v4318_v15, %s4496_s10 }
 0xfe7   :  { %v4310_v52 = vpop.permute.xlu1 %4309 }
 0xfe8   :  { %v4312_v54 = vunpack.i.h.bf16 %v4310_v52  ;;  %v4311_v56 = vunpack.i.l.bf16 %v4310_v52 }
 0xfea   :  { %v3479_v60 = vsel %vm321_vm2, %v3012_v30, %v4312_v54  ;;  %v3478_v62 = vsel %vm321_vm2, %v2939_v34, %v4311_v56  ;;  %v4346_v30 = vld [vmem:[%s5132_s4 + $0x18] sm:$0xff]  }
 0xfeb   :  { %v4315_v53 = vpop.permute.xlu0 %4314  ;;  %4265 = vmatpush3.bf16.msra.mxu1 %v4346_v30 }
 0xfec   :  { %v4317_v57 = vunpack.i.h.bf16 %v4315_v53  ;;  %v4316_v58 = vunpack.i.l.bf16 %v4315_v53 }
 0xfee   :  { %v3481_v63 = vsel %vm1620_vm3, %v3479_v60, %v4317_v57  ;;  %v3480_v3 = vsel %vm1620_vm3, %v3478_v62, %v4316_v58 }
 0xfef   :  { %v4320_v59 = vpop.permute.xlu1 %4319 }
 0xff0   :  { %v4322_v27 = vunpack.i.h.bf16 %v4320_v59  ;;  %v4321_v32 = vunpack.i.l.bf16 %v4320_v59 }
 0xff2   :  { %v3483_v38 = vsel %vm1623_vm4, %v3481_v63, %v4322_v27  ;;  %v3482_v2 = vsel %vm1623_vm4, %v3480_v3, %v4321_v32 }
 0xff3   :  { %v3484_v4 = vpack.c.bf16 %v3483_v38, %v3482_v2 }
 0xff5   :  { %4259 = vmatmul.mubr.msk.bf16.vlgmr.msra.gmra.mrb[44].mxu0 %vm44_vm0, %v3484_v4 }
 0xff6   :  { %4278 = vmatprep.mubr.msk.bf16.mxu0 %vm4491_vm1, %v4490_v16  ;;  %4271 = vmatpush3.bf16.msra.mxu0 %v4347_v51 }
 0xff7   :  { %4272 = vmatprep.subr.bf16.mxu0 %v4490_v16 }
 0xffa   :  { %4273 = vmatpush3.bf16.msra.mxu0 %v4348_v25 }
 0xffb   :  { %4274 = vmatprep.subr.bf16.mxu0 %v4490_v16 }
 0xffe   :  { %4275 = vmatpush3.bf16.msra.mxu0 %v4349_v26 }
 0xfff   :  { %4276 = vmatprep.subr.bf16.mxu0 %v4490_v16 }
0x1002   :  { %4277 = vmatpush3.bf16.msra.mxu0 %v4350_v33 }
0x10c8   :  { %v3543_v7 = vpop.f32.mrb[44].mxu0 }
0x10c9   :  { %v3544_v8 = vadd.f32 %v3543_v7, %v3493_v5  ;;  %v4260_v9 = vpop.f32.mrb[45].mxu0 }
0x10ca   :  { %v3546_v0 = vpop.f32.mrb[46].mxu0 }
0x10cb   :  { %v5060_v10 = vadd.f32 %v3544_v8, %v4841_v19  ;;  %v3547_v11 = vadd.f32 %v3546_v0, %v3493_v5  ;;  %v4261_v1 = vpop.f32.mrb[47].mxu0 }
0x10cc   :  { %v3908_v1 = vld [vmem:[%s5129_s1 + $0x18] ss:$0 sm:$0xff] }
0x10cd   :  { %v5063_v43 = vadd.f32 %v3547_v11, %v4844_v22  ;;  %v3552_v13 = vsel %vm44_vm0, %v5060_v10, 0.0 }
0x10ce   :  { %3553 = vadd.xlane.f32.xlu0 %v3552_v13 }
0x10cf   :  { %v3555_v14 = vsel %vm44_vm0, %v5063_v43, 0.0 }
0x10d0   :  { %3556 = vadd.xlane.f32.xlu1 %v3555_v14 }
0x115b   :  { %v3554_v55 = vpop.xlane.xlu0 %3553 }
0x115c   :  { %v3558_v17 = vmul.f32 0.03125, %v3554_v55 }
0x115d   :  { %v3557_v18 = vpop.xlane.xlu1 %3556 }
0x115e   :  { %v3560_v20 = vsub.f32 %v5060_v10, %v3558_v17  ;;  %v3559_v19 = vmul.f32 0.03125, %v3557_v18 }
0x1160   :  { %v3561_v50 = vsub.f32 %v5063_v43, %v3559_v19  ;;  %v3562_v21 = vmul.f32 %v3560_v20, %v3560_v20 }
0x1162   :  { %v3564_v22 = vsel %vm44_vm0, %v3562_v21, 0.0  ;;  %v3563_v23 = vmul.f32 %v3561_v50, %v3561_v50 }
0x1163   :  { %3565 = vadd.xlane.f32.xlu0 %v3564_v22 }
0x1164   :  { %v3567_v24 = vsel %vm44_vm0, %v3563_v23, 0.0 }
0x1167   :  { %3568 = vadd.xlane.f32.xlu0 %v3567_v24 }
0x11f0   :  { %v3566_v31 = vpop.xlane.xlu0 %3565 }
0x11f1   :  { %v3570_v34 = vmul.f32 0.03125, %v3566_v31 }
0x11f3   :  { %v3572_v61 = vadd.f32 1e-05, %v3570_v34 }
0x11f4   :  { %v3569_v35 = vpop.xlane.xlu0 %3568 }
0x11f5   :  { %4431 = vrsqrt.f32 %v3572_v61  ;;  %v3571_v36 = vmul.f32 0.03125, %v3569_v35 }
0x11f7   :  { %v3573_v37 = vadd.f32 1e-05, %v3571_v36 }
0x11f9   :  { %4433 = vrsqrt.f32 %v3573_v37 }
0x11ff   :  { %v4432_v6 = vpop.eup %4431 }
0x1200   :  { %v3576_v40 = vmul.f32 %v4432_v6, %v3560_v20 }
0x1202   :  { %v3582_v42 = vmul.f32 %v3581_v39, %v3576_v40 }
0x1203   :  { %v4434_v41 = vpop.eup %4433 }
0x1204   :  { %v3577_v44 = vmul.f32 %v4434_v41, %v3561_v50  ;;  %v3588_v46 = vadd.f32 %v3587_v28, %v3582_v42 }
0x1206   :  { %v3583_v45 = vmul.f32 %v3581_v39, %v3577_v44 }
0x1208   :  { %v3589_v47 = vadd.f32 %v3587_v28, %v3583_v45 }
0x120a   :  { %v3590_v48 = vpack.c.bf16 %v3589_v47, %v3588_v46 }
0x120c   :  { %4267 = vmatmul.mubr.msk.bf16.vlgmr.msra.gmra.mrb[56].mxu1 %vm44_vm0, %v3590_v48 }
0x12df   :  { %v3651_v15 = vpop.f32.mrb[56].mxu1 }
0x12e0   :  { %v3652_v12 = vadd.f32 %v3896_v49, %v3651_v15  ;;  %v4268_v52 = vpop.f32.mrb[57].mxu1 }
0x12e1   :  { %v3654_v53 = vpop.f32.mrb[58].mxu1 }
0x12e2   :  { %v3660_v54 = vmul.f32 0.044715, %v3652_v12  ;;  %v3655_v56 = vadd.f32 %v3896_v49, %v3654_v53  ;;  %v4269_v57 = vpop.f32.mrb[59].mxu1  ;;  %v3658_v5 = vmul.f32 0.5, %v3652_v12 }
0x12e4   :  { %v3662_v58 = vmul.f32 %v3660_v54, %v3652_v12  ;;  %v3661_v59 = vmul.f32 0.044715, %v3655_v56  ;;  %v3659_v7 = vmul.f32 0.5, %v3655_v56 }
0x12e6   :  { %v3664_v60 = vmul.f32 %v3662_v58, %v3652_v12  ;;  %v3663_v62 = vmul.f32 %v3661_v59, %v3655_v56 }
0x12e8   :  { %v3666_v27 = vadd.f32 %v3664_v60, %v3652_v12  ;;  %v3665_v32 = vmul.f32 %v3663_v62, %v3655_v56 }
0x12ea   :  { %v3668_v63 = vmul.f32 0.7978846, %v3666_v27  ;;  %v3667_v16 = vadd.f32 %v3665_v32, %v3655_v56 }
0x12ec   :  { %4435 = vtanh.f32 %v3668_v63  ;;  %v3669_v3 = vmul.f32 0.7978846, %v3667_v16 }
0x12ee   :  { %4437 = vtanh.f32 %v3669_v3 }
0x12f6   :  { %v4436_v38 = vpop.eup %4435 }
0x12f7   :  { %v3672_v2 = vadd.f32 1.0, %v4436_v38 }
0x12f8   :  { %v4438_v4 = vpop.eup %4437 }
0x12f9   :  { %v3673_v8 = vadd.f32 1.0, %v4438_v4  ;;  %v3674_v9 = vmul.f32 %v3672_v2, %v3658_v5 }
0x12fb   :  { %v3675_v0 = vmul.f32 %v3673_v8, %v3659_v7 }
0x12fd   :  { %v3676_v11 = vpack.c.bf16 %v3675_v0, %v3674_v9 }
0x12ff   :  { %4279 = vmatmul.mubr.msk.bf16.vlgmr.msra.gmra.mrb[48].mxu0 %vm1854_vm5, %v3676_v11 }
0x13d2   :  { %v3751_v13 = vpop.f32.mrb[48].mxu0 }
0x13d3   :  { %v3752_v14 = vadd.f32 %v3908_v1, %v3751_v13  ;;  %v4280_v55 = vpop.f32.mrb[49].mxu0 }
0x13d4   :  { %v3754_v17 = vpop.f32.mrb[50].mxu0 }
0x13d5   :  { %v3758_v18 = vadd.f32 %v3752_v14, %v5060_v10  ;;  %v3755_v20 = vadd.f32 %v3908_v1, %v3754_v17  ;;  %v4281_v19 = vpop.f32.mrb[51].mxu0 }
0x13d7   :  { %3760 = vst.msk [vmem:[#allocation5] sm:$0xff] %vm44_vm0, %v3758_v18  ;;  %v3759_v50 = vadd.f32 %v3755_v20, %v5063_v43 }
0x13d9   :  { %3761 = vst.msk [vmem:[#allocation5 + $0x8] sm:$0xff] %vm44_vm0, %v3759_v50 }
0x13da   :  { %4472 = shalt.err (!%p4469_p12)
}
0x13db   :  { %s4473_s19 = scalar_lea.hbm %s5134_s6, 256 }
0x13dc   :  { %p4474_p13 = scmp.ne.s32.totalorder %s5134_s6, %s4473_s19  ;;  %p4477_p0 = scmp.lt.u32.totalorder %s4473_s19, %s5134_s6 }
0x13de   :  { %p4479_p1 = pnand %p4477_p0, %p4474_p13 }
0x13e0   :  { %4482 = shalt.err (!%p4479_p1)
}
0x13e1   :  { %3773 = dma.vmem_to_hbm [thread:$0]  %s3768_s16, 256, %s5134_s6, [#allocation4], %s4488_s7, %s4488_s7, %s4489_s8  }
0x13e2   :  { %4485 = dma.done.wait [#allocation4], 256  }
0x13e3   :  { %4486 = vsyncadd [#allocation4], 4294967040 }
0x13e4   :  { %3777 = vsyncpa [#allocation3], 1 }
0x13e5   :  { %3778 = vsyncpa [#allocation4], 1 }

</bundles_post_ra>
